<compile_context>
chip_gen: v7x
topology: tpu7x:2x2x1
jax: 0.10.0
libtpu: 0.0.40
codegen_flags: <defaults>
</compile_context>

<pallas_src>
import jax
import jax.numpy as jnp
from jax.experimental import pallas as pl
from jax.experimental.pallas import tpu as pltpu


def _make_kernel(K, stride, padding, H, W, H_out, W_out, Cin, Cout, activ):
    HW = H_out * W_out

    def kernel(x_ref, w_ref, shift_ref, alpha_ref, o_ref, xpad_ref, p_ref):
        # x_ref:     (1, Cin, H, W)     one (unpadded) NCHW image
        # w_ref:     (Cout, K*K*Cin)    BN-scale-folded weights, (kh,kw,ci)-minor order
        # shift_ref: (Cout, 1)          folded BN shift (zeros if norm='none')
        # alpha_ref: (1,) in SMEM       PReLU slope (unused for other activs)
        # o_ref:     (1, Cout, HW)      lane-dense output (HW = H_out*W_out lanes)
        # xpad_ref:  (Cin, Hp, Wp)      VMEM scratch: zero-padded input
        # p_ref:     (K*K*Cin, HW)      VMEM scratch: im2col matrix

        # Zero padding inside the kernel (no jnp.pad HBM copy in the wrapper).
        if padding > 0:
            xpad_ref[...] = jnp.zeros_like(xpad_ref)
            xpad_ref[:, padding:padding + H, padding:padding + W] = x_ref[0]
        else:
            xpad_ref[...] = x_ref[0]

        # im2col:
        #   P[(kh*K + kw)*Cin + ci, oh*W_out + ow] = xpad[ci, kh + oh*s, kw + ow*s]
        for kh in range(K):
            for kw in range(K):
                t = kh * K + kw
                patch = xpad_ref[:,
                                 kh:kh + (H_out - 1) * stride + 1:stride,
                                 kw:kw + (W_out - 1) * stride + 1:stride]
                p_ref[t * Cin:(t + 1) * Cin, :] = patch.reshape(Cin, HW)

        # Single MXU matmul: (Cout, K*K*Cin) x (K*K*Cin, HW) -> (Cout, HW).
        acc = jnp.dot(w_ref[...], p_ref[...], preferred_element_type=jnp.float32)

        # Folded BatchNorm (eval mode): scale already in the weights; add shift.
        y = acc + shift_ref[...]

        if activ == 'relu':
            y = jnp.maximum(y, 0.0)
        elif activ == 'prelu':
            y = jnp.where(y > 0, y, y * alpha_ref[0])
        elif activ == 'sigmoid':
            y = jax.nn.sigmoid(y)
        # activ == 'none': passthrough

        o_ref[0] = y.astype(o_ref.dtype)

    return kernel


def conv2d_block(x_nchw, w_oihw, gamma, beta, run_mean, run_var, prelu_alpha,
                 *, padding=0, stride=1, norm='none', activ='none', eps=1e-5):
    """Pallas implementation of Conv2dBlock.forward (BatchNorm in eval mode)."""
    N, Cin, H, W = x_nchw.shape
    Cout, Cin_w, K, K2 = w_oihw.shape
    assert K == K2
    if Cin_w != Cin:
        # TODO(synk): grouped conv (group > 1) not implemented.
        raise NotImplementedError("grouped conv (group > 1) not implemented")

    Hp, Wp = H + 2 * padding, W + 2 * padding
    H_out = (Hp - K) // stride + 1
    W_out = (Wp - K) // stride + 1
    HW = H_out * W_out

    # Fold BatchNorm (eval mode): per-channel scale commutes with the conv, so
    # it goes into the weights; only the shift is applied in the kernel.
    if norm == 'bn':
        scale = gamma / jnp.sqrt(run_var + eps)
        shift = beta - run_mean * scale
    elif norm == 'none':
        scale = jnp.ones((Cout,), jnp.float32)
        shift = jnp.zeros((Cout,), jnp.float32)
    else:
        raise ValueError(f'Unsupported normalization: {norm}')

    # (Cout, Cin, K, K) -> scale-folded -> (Cout, K, K, Cin) -> (Cout, K*K*Cin)
    # The (kh, kw, ci)-minor ordering matches the im2col row order in the kernel.
    w2 = w_oihw.astype(jnp.float32) * scale.astype(jnp.float32)[:, None, None, None]
    w2 = jnp.transpose(w2, (0, 2, 3, 1)).reshape(Cout, K * K * Cin)
    shift = shift.reshape(Cout, 1).astype(jnp.float32)
    # nn.PReLU() default: a single learnable slope.
    alpha = jnp.asarray(prelu_alpha, jnp.float32).reshape(1)

    x = x_nchw.astype(jnp.float32)
    # TODO(synk): cast x/w2 operands to bfloat16 (keep f32 accumulation) on
    # v6e/v7x for ~2x less HBM/VMEM traffic once callers tolerate bf16 rounding.

    kernel = _make_kernel(K, stride, padding, H, W, H_out, W_out, Cin, Cout, activ)

    out = pl.pallas_call(
        kernel,
        out_shape=jax.ShapeDtypeStruct((N, Cout, HW), x_nchw.dtype),
        grid_spec=pltpu.PrefetchScalarGridSpec(
            num_scalar_prefetch=0,
            grid=(N,),  # one image per step; v7x's two TensorCores split the batch
            in_specs=[
                pl.BlockSpec((1, Cin, H, W), lambda n: (n, 0, 0, 0)),
                pl.BlockSpec((Cout, K * K * Cin), lambda n: (0, 0)),
                pl.BlockSpec((Cout, 1), lambda n: (0, 0)),
                pl.BlockSpec(memory_space=pltpu.MemorySpace.SMEM),  # PReLU slope
            ],
            out_specs=pl.BlockSpec((1, Cout, HW), lambda n: (n, 0, 0)),
            scratch_shapes=[
                pltpu.VMEM((Cin, Hp, Wp), jnp.float32),       # zero-padded input
                pltpu.VMEM((K * K * Cin, HW), jnp.float32),   # im2col matrix
            ],
        ),
        compiler_params=pltpu.CompilerParams(
            dimension_semantics=("parallel",)),
    )(x, w2, shift, alpha)

    # (N, Cout, H_out*W_out) is already NCHW order -> free reshape, no transpose.
    return out.reshape(N, Cout, H_out, W_out)


if __name__ == "__main__":
    key = jax.random.PRNGKey(0)
    k1, k2, k3, k4, k5, k6 = jax.random.split(key, 6)

    # Conv2dBlock(in_chan=4, out_chan=8, kernel_size=3, padding=1, stride=1,
    #             group=1, norm='bn', activ='prelu')
    N, Cin, H, W = 2, 4, 16, 16
    Cout, K, pad, stride = 8, 3, 1, 1
    eps = 1e-5

    x = jax.random.normal(k1, (N, Cin, H, W), jnp.float32)
    w = jax.random.normal(k2, (Cout, Cin, K, K), jnp.float32) * 0.1
    gamma = 1.0 + 0.1 * jax.random.normal(k3, (Cout,), jnp.float32)
    beta = 0.1 * jax.random.normal(k4, (Cout,), jnp.float32)
    run_mean = 0.1 * jax.random.normal(k5, (Cout,), jnp.float32)
    run_var = jnp.abs(jax.random.normal(k6, (Cout,), jnp.float32)) + 0.5
    prelu_alpha = jnp.float32(0.25)  # nn.PReLU() default init

    out = conv2d_block(x, w, gamma, beta, run_mean, run_var, prelu_alpha,
                       padding=pad, stride=stride, norm='bn', activ='prelu',
                       eps=eps)
    out = jax.block_until_ready(out)

    # Pure-JAX reference for correctness.
    ref = jax.lax.conv_general_dilated(
        x, w, window_strides=(stride, stride),
        padding=[(pad, pad), (pad, pad)],
        dimension_numbers=('NCHW', 'OIHW', 'NCHW'))
    bn_scale = (gamma / jnp.sqrt(run_var + eps)).reshape(1, Cout, 1, 1)
    bn_shift = beta.reshape(1, Cout, 1, 1) - run_mean.reshape(1, Cout, 1, 1) * bn_scale
    ref = ref * bn_scale + bn_shift
    ref = jnp.where(ref > 0, ref, prelu_alpha * ref)

    assert out.shape == (N, Cout, H, W)
    assert jnp.allclose(out, ref, rtol=1e-4, atol=1e-4), float(
        jnp.max(jnp.abs(out - ref)))
    print("KERNEL_OK")
</pallas_src>

<mosaic_0001>
module attributes {stable_mosaic.version = 11 : i64} {
  func.func @kernel(%arg0: i32, %arg1: memref<1x4x16x16xf32, #tpu.memory_space<vmem>>, %arg2: memref<8x36xf32, #tpu.memory_space<vmem>>, %arg3: memref<8x1xf32, #tpu.memory_space<vmem>>, %arg4: memref<1xf32, #tpu.memory_space<smem>>, %arg5: memref<1x8x256xf32, #tpu.memory_space<vmem>>, %arg6: memref<4x18x18xf32, #tpu.memory_space<vmem>>, %arg7: memref<36x256xf32, #tpu.memory_space<vmem>>) attributes {dimension_semantics = [#tpu.dimension_semantics<parallel>], iteration_bounds = array<i64: 2>, scalar_prefetch = 0 : i64, scratch_operands = 2 : i64, tpu.core_type = #tpu.core_type<tc>, window_params = [{transform_indices = @transform_0, window_bounds = array<i64: 1, 4, 16, 16>}, {pipeline_mode = #tpu.pipeline_mode<synchronous>, transform_indices = @transform_1, window_bounds = array<i64: 8, 36>}, {pipeline_mode = #tpu.pipeline_mode<synchronous>, transform_indices = @transform_2, window_bounds = array<i64: 8, 1>}, {transform_indices = @transform_3, window_bounds = array<i64: 1>}, {transform_indices = @transform_4, window_bounds = array<i64: 1, 8, 256>}]} {
    %cst = arith.constant 0.000000e+00 : f32
    %0 = vector.broadcast %cst : f32 to vector<4x18x18xf32>
    %c0 = arith.constant 0 : index
    %c0_0 = arith.constant 0 : index
    %c0_1 = arith.constant 0 : index
    %1 = vector.load %arg6[%c0, %c0_0, %c0_1] : memref<4x18x18xf32, #tpu.memory_space<vmem>>, vector<4x18x18xf32>
    tpu.vector_store %arg6[%c0, %c0_0, %c0_1], %0 {strides = array<i32>} : memref<4x18x18xf32, #tpu.memory_space<vmem>>, vector<4x18x18xf32>,
    %c0_2 = arith.constant 0 : index
    %c0_3 = arith.constant 0 : index
    %c0_4 = arith.constant 0 : index
    %c0_5 = arith.constant 0 : index
    %2 = vector.load %arg1[%c0_2, %c0_3, %c0_4, %c0_5] : memref<1x4x16x16xf32, #tpu.memory_space<vmem>>, vector<1x4x16x16xf32>
    %3 = vector.shape_cast %2 : vector<1x4x16x16xf32> to vector<4x16x16xf32>
    %c0_6 = arith.constant 0 : index
    %c1 = arith.constant 1 : index
    %c1_7 = arith.constant 1 : index
    %4 = vector.load %arg6[%c0_6, %c1, %c1_7] : memref<4x18x18xf32, #tpu.memory_space<vmem>>, vector<4x16x16xf32>
    tpu.vector_store %arg6[%c0_6, %c1, %c1_7], %3 {strides = array<i32>} : memref<4x18x18xf32, #tpu.memory_space<vmem>>, vector<4x16x16xf32>,
    %c0_8 = arith.constant 0 : index
    %c0_9 = arith.constant 0 : index
    %c0_10 = arith.constant 0 : index
    %5 = vector.load %arg6[%c0_8, %c0_9, %c0_10] : memref<4x18x18xf32, #tpu.memory_space<vmem>>, vector<4x16x16xf32>
    %6 = vector.shape_cast %5 : vector<4x16x16xf32> to vector<4x256xf32>
    %c0_11 = arith.constant 0 : index
    %c0_12 = arith.constant 0 : index
    %7 = vector.load %arg7[%c0_11, %c0_12] : memref<36x256xf32, #tpu.memory_space<vmem>>, vector<4x256xf32>
    tpu.vector_store %arg7[%c0_11, %c0_12], %6 {strides = array<i32>} : memref<36x256xf32, #tpu.memory_space<vmem>>, vector<4x256xf32>,
    %c0_13 = arith.constant 0 : index
    %c0_14 = arith.constant 0 : index
    %c1_15 = arith.constant 1 : index
    %8 = vector.load %arg6[%c0_13, %c0_14, %c1_15] : memref<4x18x18xf32, #tpu.memory_space<vmem>>, vector<4x16x16xf32>
    %9 = vector.shape_cast %8 : vector<4x16x16xf32> to vector<4x256xf32>
    %c4 = arith.constant 4 : index
    %c0_16 = arith.constant 0 : index
    %10 = vector.load %arg7[%c4, %c0_16] : memref<36x256xf32, #tpu.memory_space<vmem>>, vector<4x256xf32>
    tpu.vector_store %arg7[%c4, %c0_16], %9 {strides = array<i32>} : memref<36x256xf32, #tpu.memory_space<vmem>>, vector<4x256xf32>,
    %c0_17 = arith.constant 0 : index
    %c0_18 = arith.constant 0 : index
    %c2 = arith.constant 2 : index
    %11 = vector.load %arg6[%c0_17, %c0_18, %c2] : memref<4x18x18xf32, #tpu.memory_space<vmem>>, vector<4x16x16xf32>
    %12 = vector.shape_cast %11 : vector<4x16x16xf32> to vector<4x256xf32>
    %c8 = arith.constant 8 : index
    %c0_19 = arith.constant 0 : index
    %13 = vector.load %arg7[%c8, %c0_19] : memref<36x256xf32, #tpu.memory_space<vmem>>, vector<4x256xf32>
    tpu.vector_store %arg7[%c8, %c0_19], %12 {strides = array<i32>} : memref<36x256xf32, #tpu.memory_space<vmem>>, vector<4x256xf32>,
    %c0_20 = arith.constant 0 : index
    %c1_21 = arith.constant 1 : index
    %c0_22 = arith.constant 0 : index
    %14 = vector.load %arg6[%c0_20, %c1_21, %c0_22] : memref<4x18x18xf32, #tpu.memory_space<vmem>>, vector<4x16x16xf32>
    %15 = vector.shape_cast %14 : vector<4x16x16xf32> to vector<4x256xf32>
    %c12 = arith.constant 12 : index
    %c0_23 = arith.constant 0 : index
    %16 = vector.load %arg7[%c12, %c0_23] : memref<36x256xf32, #tpu.memory_space<vmem>>, vector<4x256xf32>
    tpu.vector_store %arg7[%c12, %c0_23], %15 {strides = array<i32>} : memref<36x256xf32, #tpu.memory_space<vmem>>, vector<4x256xf32>,
    %c0_24 = arith.constant 0 : index
    %c1_25 = arith.constant 1 : index
    %c1_26 = arith.constant 1 : index
    %17 = vector.load %arg6[%c0_24, %c1_25, %c1_26] : memref<4x18x18xf32, #tpu.memory_space<vmem>>, vector<4x16x16xf32>
    %18 = vector.shape_cast %17 : vector<4x16x16xf32> to vector<4x256xf32>
    %c16 = arith.constant 16 : index
    %c0_27 = arith.constant 0 : index
    %19 = vector.load %arg7[%c16, %c0_27] : memref<36x256xf32, #tpu.memory_space<vmem>>, vector<4x256xf32>
    tpu.vector_store %arg7[%c16, %c0_27], %18 {strides = array<i32>} : memref<36x256xf32, #tpu.memory_space<vmem>>, vector<4x256xf32>,
    %c0_28 = arith.constant 0 : index
    %c1_29 = arith.constant 1 : index
    %c2_30 = arith.constant 2 : index
    %20 = vector.load %arg6[%c0_28, %c1_29, %c2_30] : memref<4x18x18xf32, #tpu.memory_space<vmem>>, vector<4x16x16xf32>
    %21 = vector.shape_cast %20 : vector<4x16x16xf32> to vector<4x256xf32>
    %c20 = arith.constant 20 : index
    %c0_31 = arith.constant 0 : index
    %22 = vector.load %arg7[%c20, %c0_31] : memref<36x256xf32, #tpu.memory_space<vmem>>, vector<4x256xf32>
    tpu.vector_store %arg7[%c20, %c0_31], %21 {strides = array<i32>} : memref<36x256xf32, #tpu.memory_space<vmem>>, vector<4x256xf32>,
    %c0_32 = arith.constant 0 : index
    %c2_33 = arith.constant 2 : index
    %c0_34 = arith.constant 0 : index
    %23 = vector.load %arg6[%c0_32, %c2_33, %c0_34] : memref<4x18x18xf32, #tpu.memory_space<vmem>>, vector<4x16x16xf32>
    %24 = vector.shape_cast %23 : vector<4x16x16xf32> to vector<4x256xf32>
    %c24 = arith.constant 24 : index
    %c0_35 = arith.constant 0 : index
    %25 = vector.load %arg7[%c24, %c0_35] : memref<36x256xf32, #tpu.memory_space<vmem>>, vector<4x256xf32>
    tpu.vector_store %arg7[%c24, %c0_35], %24 {strides = array<i32>} : memref<36x256xf32, #tpu.memory_space<vmem>>, vector<4x256xf32>,
    %c0_36 = arith.constant 0 : index
    %c2_37 = arith.constant 2 : index
    %c1_38 = arith.constant 1 : index
    %26 = vector.load %arg6[%c0_36, %c2_37, %c1_38] : memref<4x18x18xf32, #tpu.memory_space<vmem>>, vector<4x16x16xf32>
    %27 = vector.shape_cast %26 : vector<4x16x16xf32> to vector<4x256xf32>
    %c28 = arith.constant 28 : index
    %c0_39 = arith.constant 0 : index
    %28 = vector.load %arg7[%c28, %c0_39] : memref<36x256xf32, #tpu.memory_space<vmem>>, vector<4x256xf32>
    tpu.vector_store %arg7[%c28, %c0_39], %27 {strides = array<i32>} : memref<36x256xf32, #tpu.memory_space<vmem>>, vector<4x256xf32>,
    %c0_40 = arith.constant 0 : index
    %c2_41 = arith.constant 2 : index
    %c2_42 = arith.constant 2 : index
    %29 = vector.load %arg6[%c0_40, %c2_41, %c2_42] : memref<4x18x18xf32, #tpu.memory_space<vmem>>, vector<4x16x16xf32>
    %30 = vector.shape_cast %29 : vector<4x16x16xf32> to vector<4x256xf32>
    %c32 = arith.constant 32 : index
    %c0_43 = arith.constant 0 : index
    %31 = vector.load %arg7[%c32, %c0_43] : memref<36x256xf32, #tpu.memory_space<vmem>>, vector<4x256xf32>
    tpu.vector_store %arg7[%c32, %c0_43], %30 {strides = array<i32>} : memref<36x256xf32, #tpu.memory_space<vmem>>, vector<4x256xf32>,
    %c0_44 = arith.constant 0 : index
    %c0_45 = arith.constant 0 : index
    %32 = vector.load %arg2[%c0_44, %c0_45] : memref<8x36xf32, #tpu.memory_space<vmem>>, vector<8x36xf32>
    %c0_46 = arith.constant 0 : index
    %c0_47 = arith.constant 0 : index
    %33 = vector.load %arg7[%c0_46, %c0_47] : memref<36x256xf32, #tpu.memory_space<vmem>>, vector<36x256xf32>
    %cst_48 = arith.constant dense<0.000000e+00> : vector<8x256xf32>
    %34 = tpu.matmul %32, %33, %cst_48 {dimension_numbers = #tpu.dot_dimension_numbers<[1], [0], [0], [1], [0, 0, 1, 1], [], []>} : vector<8x36xf32>, vector<36x256xf32>, vector<8x256xf32> -> vector<8x256xf32>
    %c0_49 = arith.constant 0 : index
    %c0_50 = arith.constant 0 : index
    %35 = vector.load %arg3[%c0_49, %c0_50] : memref<8x1xf32, #tpu.memory_space<vmem>>, vector<8x1xf32>
    %36 = vector.broadcast %35 : vector<8x1xf32> to vector<8x256xf32>
    %37 = arith.addf %34, %36 : vector<8x256xf32>
    %cst_51 = arith.constant 0.000000e+00 : f32
    %38 = vector.broadcast %cst_51 : f32 to vector<8x256xf32>
    %39 = arith.cmpf ogt, %37, %38 : vector<8x256xf32>
    %c0_52 = arith.constant 0 : index
    %40 = memref.load %arg4[%c0_52] : memref<1xf32, #tpu.memory_space<smem>>
    %41 = vector.broadcast %40 : f32 to vector<8x256xf32>
    %42 = arith.mulf %37, %41 : vector<8x256xf32>
    %43 = arith.select %39, %37, %42 : vector<8x256xi1>, vector<8x256xf32>
    %c0_53 = arith.constant 0 : index
    %c0_54 = arith.constant 0 : index
    %c0_55 = arith.constant 0 : index
    %44 = vector.load %arg5[%c0_53, %c0_54, %c0_55] : memref<1x8x256xf32, #tpu.memory_space<vmem>>, vector<1x8x256xf32>
    %45 = vector.shape_cast %44 : vector<1x8x256xf32> to vector<8x256xf32>
    %46 = vector.shape_cast %43 : vector<8x256xf32> to vector<1x8x256xf32>
    tpu.vector_store %arg5[%c0_53, %c0_54, %c0_55], %46 {strides = array<i32>} : memref<1x8x256xf32, #tpu.memory_space<vmem>>, vector<1x8x256xf32>,
    return
  }
  func.func @transform_0(%arg0: i32) -> (i32, i32, i32, i32) {
    %c0_i32 = arith.constant 0 : i32
    %c0_i32_0 = arith.constant 0 : i32
    %c0_i32_1 = arith.constant 0 : i32
    %c0_i32_2 = arith.constant 0 : i32
    return %arg0, %c0_i32, %c0_i32_0, %c0_i32_1 : i32, i32, i32, i32
  }
  func.func @transform_1(%arg0: i32) -> (i32, i32) {
    %c0_i32 = arith.constant 0 : i32
    %c0_i32_0 = arith.constant 0 : i32
    %c0_i32_1 = arith.constant 0 : i32
    return %c0_i32, %c0_i32_0 : i32, i32
  }
  func.func @transform_2(%arg0: i32) -> (i32, i32) {
    %c0_i32 = arith.constant 0 : i32
    %c0_i32_0 = arith.constant 0 : i32
    %c0_i32_1 = arith.constant 0 : i32
    return %c0_i32, %c0_i32_0 : i32, i32
  }
  func.func @transform_3(%arg0: i32) -> i32 {
    %c0_i32 = arith.constant 0 : i32
    %c0_i32_0 = arith.constant 0 : i32
    return %c0_i32 : i32
  }
  func.func @transform_4(%arg0: i32) -> (i32, i32, i32) {
    %c0_i32 = arith.constant 0 : i32
    %c0_i32_0 = arith.constant 0 : i32
    %c0_i32_1 = arith.constant 0 : i32
    return %arg0, %c0_i32, %c0_i32_0 : i32, i32, i32
  }
}

</mosaic_0001>

<bundles_post_ra>
// kernel: tpu_custom_call.1
= control target key start
LH: loop header
LB: loop body
LE: loop exit
PB: predicated region body
PF: predicated region fallthrough
CT: control target
= control target key end

     0   :  { %s4443_s0 = inlined_call_operand.hbm [shape: f32[2,4,16,16], index: 0, kind: input, shape index: {}]   ;;  %s4444_s1 = inlined_call_operand.vmem [shape: f32[8,36], index: 1, kind: input, shape index: {}]   ;;  %s4445_s2 = inlined_call_operand.vmem [shape: f32[8,1], index: 2, kind: input, shape index: {}]   ;;  %s4446_s3 = inlined_call_operand.<no memory space> [shape: f32[1], index: 3, kind: input, shape index: {}]   ;;  %s4447_s4 = inlined_call_operand.hbm [shape: f32[2,8,256], index: 4, kind: output, shape index: {}]  }
   0x1   :  { %9 = sst [smem:[#allocation4]] %s4446_s3 }
   0x2   :  { %10 = vsyncpa [#allocation6], 0 }
   0x3   :  { %12 = vsyncpa [#allocation6 + $0x1], 0 }
   0x4   :  { %13 = vsyncpa [#allocation7], 0 }
   0x5   :  { %15 = vsyncpa [#allocation7 + $0x1], 0  ;;  %s2903_s17 = smov 0   ;;  %s2905_s18 = smov 0  }
   0x6   :  { %s2907_s19 = smov 0   ;;  %s2909_s20 = smov 0  }
   0x7 LB: > { %s2924_s3 = sadd.s32 4294967295, %s2855_s20   ;;  %s2641_s21 = sadd.s32 4294967294, %s2855_s20   ;;  %s2855_s20 = sphi %s2909_s20, %s4533_s20   ;;  %s2851_s19 = sphi %s2907_s19, %s4532_s19   ;;  %s2847_s18 = sphi %s2905_s18, %s4531_s18   ;;  %s2843_s17 = sphi %s2903_s17, %s4530_s17  }
   0x8   : > { %s2928_s22 = sadd.s32 1, %s2855_s20   ;;  %s28_s23 = sadd.s32 1, %s2851_s19 }
   0x9   : > { %s25_s24 = ssub.s32 %s2855_s20, %s2928_s22  ;;  %p35_p0 = scmp.ne.s32.totalorder %s2851_s19, %s2847_s18 }
   0xa   : > { %p26_p1 = scmp.eq.s32.totalorder %s25_s24, 0  ;;  %p36_p2 = scmp.eq.s32.totalorder %s2855_s20, 0 }
   0xb   : > { %p41_p3 = scmp.ne.s32.totalorder %s2847_s18, %s2843_s17  ;;  %p42_p4 = scmp.eq.s32.totalorder %s2924_s3, 0 }
   0xc   : > { %s2940_s25 = scalar_select %p26_p1, %s2851_s19, %s28_s23  }
   0xd   : > { %p2942_p5 = por %p36_p2, %p35_p0  ;;  %p2946_p6 = por %p42_p4, %p41_p3 }
   0xe   : > { %p128_p7 = scmp.eq.s32.totalorder %s2924_s3, 1  ;;  %p134_p8 = scmp.eq.s32.totalorder %s2641_s21, 1 }
   0xf   : > { %p2680_p10 = scmp.lt.s32.totalorder %s2855_s20, 2  ;;  %s163_s30 = sand.u32 1, %s2851_s19  }
  0x10   : > { %p2953_p11 = por %p128_p7, %p35_p0  ;;  %p2957_p12 = por %p134_p8, %p41_p3 }
  0x11   : > { %s2658_s5 = sshll.u32 %s2855_s20, 10  ;;  %s2644_s6 = sshll.u32 %s163_s30, 6 }
  0x12   : > { %s4474_s28 = scalar_select %p2953_p11, 1, 0 }
  0x13   : > { %s4475_s29 = scalar_select %p2957_p12, 1, 0 }
  0x14   : > { %s2966_s9 = scalar_lea.hbm %s4443_s0, %s2658_s5  ;;  %s167_s10 = scalar_lea.vmem [#allocation5], %s2644_s6 }
  0x15   : > { %s174_s11 = sshll.u32 %s167_s10, 4  ;;  %p2970_p13 = pnand %p2680_p10, %p2942_p5  ;;  %s2974_s11 = int_to_ptr.vmem [resolvable:$true] %s174_s11 }
  0x16   : > { %s2976_s13 = scalar_lea.sflag [#allocation6], %s163_s30  ;;  %s2759_s14 = scalar_lea.hbm %s2966_s9, 1024 }
  0x17   : > { %p2760_p0 = scmp.ne.s32.totalorder %s2966_s9, %s2759_s14  ;;  %p2761_p1 = pneg %p2970_p13 }
  0x18   : > { %s2764_s21 = scalar_lea.hbm %s4443_s0, 2048  ;;  %p2765_p4 = scmp.lt.u32.totalorder %s2966_s9, %s4443_s0 }
  0x19   : > { %p2762_p2 = pnand %p2761_p1, %p2760_p0  ;;  %p2766_p5 = scmp.lt.u32.totalorder %s2764_s21, %s2759_s14 }
  0x1a   : > { %p2768_p8 = scmp.lt.u32.totalorder %s2759_s14, %s2966_s9 }
  0x1b   : > { %p2763_p3 = pneg %p2762_p2  ;;  %p2767_p7 = por %p2766_p5, %p2765_p4 }
  0x1d   : > { %p2769_p10 = por %p2768_p8, %p2767_p7 }
  0x1f   : > { %p2770_p9 = pnand %p2769_p10, %p2763_p3 }
  0x21   : > { %2773 = shalt.err (!%p2770_p9)
}
  0x22   : > { %s2774_s26 = scalar_lea.vmem %s2974_s11, 1024  ;;  %s2857_s30 = smov [#allocation5]  }
  0x23   : > { %p2775_p0 = scmp.ne.s32.totalorder %s2974_s11, %s2774_s26  ;;  %s2779_s5 = sshll.u32 %s2857_s30, 4  ;;  %s2780_s5 = int_to_ptr.vmem [resolvable:$false] %s2779_s5 }
  0x24   : > { %s2781_s6 = scalar_lea.vmem %s2780_s5, 2048  ;;  %p2782_p11 = scmp.lt.s32.totalorder %s2974_s11, %s2780_s5 }
  0x25   : > { %p2777_p2 = pnand %p2775_p0, %p2761_p1  ;;  %p2783_p4 = scmp.lt.s32.totalorder %s2781_s6, %s2774_s26 }
  0x27   : > { %p2778_p12 = pneg %p2777_p2  ;;  %p2784_p5 = por %p2783_p4, %p2782_p11 }
  0x29   : > { %p2785_p7 = pnand %p2784_p5, %p2778_p12 }
  0x2b   : > { %2788 = shalt.err (!%p2785_p7)
}
  0x2c   : > { %s2858_s7 = smov 128   ;;  %s2859_s8 = smov 8  }
  0x2d   : > { %2675 = dma.hbm_to_vmem [thread:$0]  (!%p2970_p13), %s2966_s9, 1024, %s2974_s11, %s2976_s13, %s2858_s7, %s2858_s7, %s2859_s8  }
  0x2e   : > { %p2647_p9 = scmp.ge.s32.totalorder %s2855_s20, 1  ;;  %p182_p1 = scmp.lt.s32.totalorder %s2855_s20, 3 }
  0x30   : > { %p183_p3 = pnand %p2647_p9, %p182_p1 }
  0x32   : > { %186 = sbr.rel (%p183_p3) target bundleno = 911 (0x38f), region = 36 }
  0x39   : > { %s3007_s10 = sand.u32 1, %s2847_s18  }
  0x3a   : > { %s2648_s14 = sshll.u32 %s3007_s10, 6  ;;  %s189_s15 = scalar_lea.sflag [#allocation6], %s3007_s10 }
  0x3b   : > { %s3011_s16 = scalar_lea.vmem [#allocation5], %s2648_s14 }
  0x3c   : > { %2834 = dma.done.wait (%p2946_p6), %s189_s15, 1024  }
  0x3d   : > { %2836 = vsyncadd (%p2946_p6), %s189_s15, 4294966272  ;;  %vm217_vm0 = vcmask 146432   ;;  %vm220_vm1 = vcmask 140288   ;;  %v4449_v0 = vmov 0.0   ;;  %v233_v1 = vld [vmem:[%s3011_s16 + $0x10] sm:$0xff]  ;;  %v231_v2 = vld [vmem:[%s3011_s16] sm:$0xff]  ;;  %v293_v17 = vlaneseq }
  0x3e   : > { %222 = vst.msk [vmem:[#allocation2 + $0x18] sm:$0xff] %vm217_vm0, %v4449_v0  ;;  %223 = vst.msk [vmem:[#allocation2 + $0x20] sm:$0xff] %vm217_vm0, %v4449_v0  ;;  %2539 = vmatprep.mubr.f32.mxu0 %v4449_v0  ;;  %s2861_s27 = smov 1   ;;  %v234_v3 = vld [vmem:[%s3011_s16 + $0x18] sm:$0xff]  ;;  %v232_v4 = vld [vmem:[%s3011_s16 + $0x8] sm:$0xff]  ;;  %vm271_vm2 = vcmask 138248  }
  0x3f   : > { %218 = vst.msk [vmem:[#allocation2] sm:$0xff] %vm217_vm0, %v4449_v0  ;;  %219 = vst.msk [vmem:[#allocation2 + $0x8] sm:$0xff] %vm217_vm0, %v4449_v0  ;;  %251 = vrot.lane.b32.xlu1 %v233_v1, %s2861_s27  ;;  %247 = vrot.lane.b32.xlu0 %v231_v2, %s2861_s27  ;;  %v236_v5 = vld [vmem:[%s3011_s16 + $0x28] sm:$0xff]  ;;  %v235_v6 = vld [vmem:[%s3011_s16 + $0x20] sm:$0xff]  ;;  %v2862_v15 = vmov 1983009808  }
  0x40   : > { %225 = vst.msk [vmem:[#allocation2 + $0x30] sm:$0xff] %vm217_vm0, %v4449_v0  ;;  %226 = vst.msk [vmem:[#allocation2 + $0x38] sm:$0xff] %vm217_vm0, %v4449_v0  ;;  %v238_v7 = vld [vmem:[%s3011_s16 + $0x38] sm:$0xff]  ;;  %v237_v8 = vld [vmem:[%s3011_s16 + $0x30] sm:$0xff]  ;;  %v291_v16 = vunpack.c.l.s4 %v2862_v15  ;;  %s2863_s9 = smov 127   ;;  %v3048_v23 = vshrl.u32 %v293_v17, 7 }
  0x41   : > { %228 = vst.msk [vmem:[#allocation2 + $0x48] sm:$0xff] %vm217_vm0, %v4449_v0  ;;  %229 = vst.msk [vmem:[#allocation2 + $0x50] sm:$0xff] %vm217_vm0, %v4449_v0  ;;  %s2864_s11 = smov 126   ;;  %s2866_s12 = smov 32   ;;  %vm480_vm3 = vcmask 130048   ;;  %vm484_vm4 = vcmask 392192  }
  0x42   : > { %224 = vst.msk [vmem:[#allocation2 + $0x28] sm:$0x3] %vm220_vm1, %v4449_v0  ;;  %221 = vst.msk [vmem:[#allocation2 + $0x10] sm:$0x3] %vm220_vm1, %v4449_v0  ;;  %v292_v22 = vunpack.c.0.s8 %v291_v16  ;;  %s2867_s13 = smov 64   ;;  %s2868_s21 = smov 16  }
  0x43   : > { %227 = vst.msk [vmem:[#allocation2 + $0x40] sm:$0x3] %vm220_vm1, %v4449_v0  ;;  %230 = vst.msk [vmem:[#allocation2 + $0x58] sm:$0x3] %vm220_vm1, %v4449_v0  ;;  %253 = vrot.lane.b32.xlu1 %v234_v3, %s2861_s27  ;;  %249 = vrot.lane.b32.xlu0 %v232_v4, %s2861_s27  ;;  %s2869_s23 = smov 48   ;;  %s2870_s24 = smov 80  }
  0x44   : > { %v3061_v32 = vsub.s32 %v292_v22, %v3048_v23  ;;  %s2871_s26 = smov 96   ;;  %s2872_s30 = smov 112   ;;  %vm482_vm5 = vcmask 261120   ;;  %vm486_vm6 = vcmask 523264   ;;  %vm488_vm7 = vcmask 654336  }
  0x45   : > { %vm490_vm8 = vcmask 785408   ;;  %vm492_vm9 = vcmask 916480   ;;  %vm2468_vm10 = vcmask 1043456   ;;  %vm2464_vm11 = vcmask 293888   ;;  %s2548_s14 = sld [smem:[#allocation4]]  ;;  %s2649_s15 = sshll.u32 %s3007_s10, 4 }
  0x46   : > { %s2659_s16 = sshll.u32 %s2924_s3, 8  ;;  %s2557_s3 = scalar_lea.sflag [#allocation7], %s3007_s10 }
  0x47   : > { %257 = vrot.lane.b32.xlu1 %v236_v5, %s2861_s27  ;;  %255 = vrot.lane.b32.xlu0 %v235_v6, %s2861_s27  ;;  %p4527_p11 = scmp.ne.s32.totalorder %s4474_s28, 0 }
  0x4b   : > { %261 = vrot.lane.b32.xlu1 %v238_v7, %s2861_s27  ;;  %259 = vrot.lane.b32.xlu0 %v237_v8, %s2861_s27  ;;  %s216_s27 = scalar_lea.vmem [#allocation8], %s2649_s15 }
  0xb1   : > { %v252_v9 = vpop.permute.xlu1 %251  ;;  %v248_v10 = vpop.permute.xlu0 %247 }
  0xb2   : > { %274 = vst.msk [vmem:[#allocation2 + $0x19] sm:$0xff] %vm271_vm2, %v252_v9  ;;  %272 = vst.msk [vmem:[#allocation2 + $0x1] sm:$0xff] %vm271_vm2, %v248_v10 }
  0xb5   : > { %v254_v11 = vpop.permute.xlu1 %253  ;;  %v250_v12 = vpop.permute.xlu0 %249 }
  0xb6   : > { %275 = vst.msk [vmem:[#allocation2 + $0x21] sm:$0xff] %vm271_vm2, %v254_v11  ;;  %273 = vst.msk [vmem:[#allocation2 + $0x9] sm:$0xff] %vm271_vm2, %v250_v12 }
  0xb9   : > { %v258_v13 = vpop.permute.xlu1 %257  ;;  %v256_v14 = vpop.permute.xlu0 %255  ;;  %v503_v24 = vld [vmem:[#allocation2] sm:$0xff]  ;;  %v505_v35 = vld [vmem:[#allocation2 + $0x18] sm:$0xff] }
  0xba   : > { %277 = vst.msk [vmem:[#allocation2 + $0x39] sm:$0xff] %vm271_vm2, %v258_v13  ;;  %276 = vst.msk [vmem:[#allocation2 + $0x31] sm:$0xff] %vm271_vm2, %v256_v14 }
  0xbd   : > { %v262_v18 = vpop.permute.xlu1 %261  ;;  %v260_v19 = vpop.permute.xlu0 %259  ;;  %v506_v20 = vld [vmem:[#allocation2 + $0x20] sm:$0xff]  ;;  %v504_v21 = vld [vmem:[#allocation2 + $0x8] sm:$0xff] }
  0xbe   : > { %279 = vst.msk [vmem:[#allocation2 + $0x51] sm:$0xff] %vm271_vm2, %v262_v18  ;;  %278 = vst.msk [vmem:[#allocation2 + $0x49] sm:$0xff] %vm271_vm2, %v260_v19  ;;  %525 = vrot.lane.b32.xlu1 %v506_v20, %s2863_s9  ;;  %521 = vrot.lane.b32.xlu0 %v504_v21, %s2863_s9  ;;  %v3050_v25 = vld [vmem:[#allocation2 + $0x9] sm:$0xff]  ;;  %v3068_v39 = vld [vmem:[#allocation2 + $0x21] sm:$0xff] }
  0xbf   : > { %v1946_v3 = vld [vmem:[#allocation2 + $0xa] sm:$0xff]  ;;  %v1948_v4 = vld [vmem:[#allocation2 + $0x22] sm:$0xff]  ;;  %v3133_v6 = vld [vmem:[#allocation2 + $0x1a] sm:$0xff] }
  0xc0   : > { %v3131_v5 = vld [vmem:[#allocation2 + $0x2] sm:$0xff] }
  0xc1   : > { %v508_v26 = vld [vmem:[#allocation2 + $0x38] sm:$0xff]  ;;  %v3052_v27 = vld [vmem:[#allocation2 + $0x30] sm:$0xff] }
  0xc2   : > { %v3054_v28 = vld [vmem:[#allocation2 + $0x39] sm:$0xff]  ;;  %529 = vrot.lane.b32.xlu0 %v508_v26, %s2863_s9  ;;  %v288_v29 = vcombine.low %v503_v24, %v3052_v27  ;;  %v356_v30 = vcombine.low %v504_v21, %v508_v26  ;;  %v357_v33 = vcombine.high %v504_v21, %v508_v26  ;;  %v289_v34 = vcombine.high %v503_v24, %v3052_v27 }
  0xc3   : > { %v1082_v31 = vcombine.high %v3050_v25, %v3054_v28  ;;  %v3113_v59 = vld [vmem:[#allocation2 + $0x3a] sm:$0xff]  ;;  %v3117_v61 = vld [vmem:[#allocation2 + $0x32] sm:$0xff] }
  0xc4   : > { %v3071_v42 = vrot.slane %v288_v29, %v3061_v32  ;;  %v3079_v46 = vrot.slane %v356_v30, %v3061_v32  ;;  %v3101_v54 = vrot.slane %v357_v33, %v3061_v32  ;;  %v3126_v1 = vrot.slane %v289_v34, %v3061_v32  ;;  %v1475_v30 = vld [vmem:[#allocation2 + $0x1] sm:$0xff]  ;;  %v1479_v33 = vld [vmem:[#allocation2 + $0x31] sm:$0xff] }
  0xc5   : > { %v510_v36 = vld [vmem:[#allocation2 + $0x50] sm:$0xff]  ;;  %v509_v37 = vld [vmem:[#allocation2 + $0x48] sm:$0xff]  ;;  %v3085_v49 = vrot.slane %v1082_v31, %v3061_v32  ;;  %v1805_v8 = vcombine.low %v1946_v3, %v3113_v59  ;;  %v1737_v10 = vcombine.low %v3131_v5, %v3117_v61  ;;  %v1477_v31 = vld [vmem:[#allocation2 + $0x19] sm:$0xff] }
  0xc6   : > { %v3064_v38 = vld [vmem:[#allocation2 + $0x51] sm:$0xff]  ;;  %533 = vrot.lane.b32.xlu1 %v510_v36, %s2863_s9  ;;  %519 = vrot.lane.b32.xlu0 %v503_v24, %s2863_s9  ;;  %v304_v40 = vcombine.low %v505_v35, %v509_v37  ;;  %v372_v41 = vcombine.low %v506_v20, %v510_v36  ;;  %v373_v44 = vcombine.high %v506_v20, %v510_v36  ;;  %v1481_v34 = vld [vmem:[#allocation2 + $0x49] sm:$0xff] }
  0xc7   : > { %v1098_v43 = vcombine.high %v3068_v39, %v3064_v38  ;;  %v305_v48 = vcombine.high %v505_v35, %v509_v37  ;;  %v3115_v60 = vld [vmem:[#allocation2 + $0x52] sm:$0xff]  ;;  %v3123_v63 = vld [vmem:[#allocation2 + $0x4a] sm:$0xff]  ;;  %v3146_v12 = vrot.slane %v1805_v8, %v3061_v32  ;;  %v3152_v14 = vrot.slane %v1737_v10, %v3061_v32 }
  0xc8   : > { %v3076_v45 = vrot.slane %v304_v40, %v3061_v32  ;;  %v3082_v47 = vrot.slane %v372_v41, %v3061_v32  ;;  %v3091_v51 = vrot.slane %v373_v44, %v3061_v32  ;;  %v1821_v9 = vcombine.low %v1948_v4, %v3115_v60 }
  0xc9   : > { %v3088_v50 = vrot.slane %v1098_v43, %v3061_v32  ;;  %v3129_v2 = vrot.slane %v305_v48, %v3061_v32  ;;  %v1753_v11 = vcombine.low %v3133_v6, %v3123_v63  ;;  %4477 = vst [vmem:[#allocation11_spill] sm:$0xff] %v3152_v14  ;;  %v1822_v22 = vcombine.high %v1948_v4, %v3115_v60 }
  0xca   : > { %523 = vrot.lane.b32.xlu1 %v505_v35, %s2863_s9  ;;  %527 = vrot.lane.b32.xlu0 %v3052_v27, %s2863_s9  ;;  %v321_v52 = vcombine.high %v3071_v42, %v3076_v45  ;;  %v389_v53 = vcombine.high %v3079_v46, %v3082_v47  ;;  %v404_v56 = vcombine.low %v3101_v54, %v3091_v51 }
  0xcb   : > { %v1129_v55 = vcombine.low %v3085_v49, %v3088_v50  ;;  %v388_v57 = vcombine.low %v3079_v46, %v3082_v47  ;;  %v320_v58 = vcombine.low %v3071_v42, %v3076_v45  ;;  %v1130_v62 = vcombine.high %v3085_v49, %v3088_v50 }
  0xcc   : > { %v336_v7 = vcombine.low %v3126_v1, %v3129_v2  ;;  %v3149_v13 = vrot.slane %v1821_v9, %v3061_v32  ;;  %v3155_v15 = vrot.slane %v1753_v11, %v3061_v32  ;;  %v405_v16 = vcombine.high %v3101_v54, %v3091_v51 }
  0xcd   : > { %v337_v18 = vcombine.high %v3126_v1, %v3129_v2  ;;  %v1013_v40 = vcombine.low %v1475_v30, %v1479_v33  ;;  %v1097_v44 = vcombine.low %v3068_v39, %v3064_v38  ;;  %v1030_v9 = vcombine.high %v1477_v31, %v1481_v34 }
  0xce   : > { %531 = vrot.lane.b32.xlu1 %v509_v37, %s2863_s9  ;;  %775 = vrot.lane.b32.xlu0 %v504_v21, %s2864_s11  ;;  %4478 = vst [vmem:[#allocation12_spill] sm:$0xff] %v3155_v15  ;;  %v1837_v17 = vcombine.low %v3146_v12, %v3149_v13  ;;  %v1838_v19 = vcombine.high %v3146_v12, %v3149_v13 }
  0xcf   : > { %v1806_v21 = vcombine.high %v1946_v3, %v3113_v59  ;;  %v1021_v48 = vrot.slane %v1013_v40, %v3061_v32  ;;  %v1105_v8 = vrot.slane %v1097_v44, %v3061_v32 }
  0xd2   : > { %779 = vrot.lane.b32.xlu1 %v506_v20, %s2864_s11  ;;  %783 = vrot.lane.b32.xlu0 %v508_v26, %s2864_s11  ;;  %v3179_v26 = vrot.slane %v1822_v22, %v3061_v32 }
  0xd4   : > { %4480 = vst [vmem:[#allocation14_spill] sm:$0xff] %v3179_v26 }
  0xd6   : > { %787 = vrot.lane.b32.xlu1 %v510_v36, %s2864_s11  ;;  %773 = vrot.lane.b32.xlu0 %v503_v24, %s2864_s11  ;;  %v3176_v24 = vrot.slane %v1806_v21, %v3061_v32 }
  0xd8   : > { %4479 = vst [vmem:[#allocation13_spill] sm:$0xff] %v3176_v24 }
  0xda   : > { %777 = vrot.lane.b32.xlu1 %v505_v35, %s2864_s11  ;;  %781 = vrot.lane.b32.xlu0 %v3052_v27, %s2864_s11  ;;  %v2865_v35 = vmov 1934713408  }
  0xdb   : > { %v323_v36 = vunpack.c.l.s4 %v2865_v35 }
  0xdd   : > { %v324_v41 = vunpack.c.0.s8 %v323_v36 }
  0xde   : > { %785 = vrot.lane.b32.xlu1 %v509_v37, %s2864_s11  ;;  %1493 = vrot.lane.b32.xlu0 %v3050_v25, %s2864_s11  ;;  %v1029_v37 = vcombine.low %v1477_v31, %v1481_v34 }
  0xe0   : > { %v1037_v43 = vrot.slane %v1029_v37, %v3061_v32 }
  0xe2   : > { %1497 = vrot.lane.b32.xlu1 %v3068_v39, %s2864_s11  ;;  %1501 = vrot.lane.b32.xlu0 %v3054_v28, %s2864_s11  ;;  %v1045_v10 = vcombine.low %v1021_v48, %v1037_v43 }
  0xe6   : > { %1505 = vrot.lane.b32.xlu1 %v3064_v38, %s2864_s11  ;;  %1963 = vrot.lane.b32.xlu0 %v1946_v3, %s2863_s9 }
  0xea   : > { %1967 = vrot.lane.b32.xlu1 %v1948_v4, %s2863_s9  ;;  %1971 = vrot.lane.b32.xlu0 %v3113_v59, %s2863_s9 }
  0xee   : > { %1975 = vrot.lane.b32.xlu1 %v3115_v60, %s2863_s9  ;;  %1491 = vrot.lane.b32.xlu0 %v1475_v30, %s2864_s11 }
  0xf2   : > { %1495 = vrot.lane.b32.xlu1 %v1477_v31, %s2864_s11  ;;  %1499 = vrot.lane.b32.xlu0 %v1479_v33, %s2864_s11 }
  0xf6   : > { %1503 = vrot.lane.b32.xlu1 %v1481_v34, %s2864_s11  ;;  %1961 = vrot.lane.b32.xlu0 %v3131_v5, %s2863_s9 }
  0xfa   : > { %1965 = vrot.lane.b32.xlu1 %v3133_v6, %s2863_s9  ;;  %1969 = vrot.lane.b32.xlu0 %v3117_v61, %s2863_s9 }
  0xfe   : > { %1973 = vrot.lane.b32.xlu1 %v3123_v63, %s2863_s9  ;;  %1245 = vrot.lane.b32.xlu0 %v3050_v25, %s2863_s9 }
 0x102   : > { %1249 = vrot.lane.b32.xlu1 %v3068_v39, %s2863_s9  ;;  %1253 = vrot.lane.b32.xlu0 %v3054_v28, %s2863_s9  ;;  %v1014_v39 = vcombine.high %v1475_v30, %v1479_v33 }
 0x106   : > { %1257 = vrot.lane.b32.xlu1 %v3064_v38, %s2863_s9  ;;  %1243 = vrot.lane.b32.xlu0 %v1475_v30, %s2863_s9 }
 0x10a   : > { %1247 = vrot.lane.b32.xlu1 %v1477_v31, %s2863_s9  ;;  %1251 = vrot.lane.b32.xlu0 %v1479_v33, %s2863_s9 }
 0x10e   : > { %1255 = vrot.lane.b32.xlu1 %v1481_v34, %s2863_s9  ;;  %2217 = vrot.lane.b32.xlu0 %v1946_v3, %s2864_s11  ;;  %v1081_v3 = vcombine.low %v3050_v25, %v3054_v28  ;;  %v3246_v25 = vrot.slane %v1030_v9, %v3061_v32  ;;  %s2571_s9 = sshll.u32 %s216_s27, 4  ;;  %s4401_s9 = int_to_ptr.vmem [resolvable:$true] %s2571_s9 }
 0x110   : > { %v1089_v38 = vrot.slane %v1081_v3, %v3061_v32 }
 0x112   : > { %2221 = vrot.lane.b32.xlu1 %v1948_v4, %s2864_s11  ;;  %2225 = vrot.lane.b32.xlu0 %v3113_v59, %s2864_s11  ;;  %v3236_v59 = vsub.s32 %v324_v41, %v3048_v23  ;;  %v1046_v4 = vcombine.high %v1021_v48, %v1037_v43  ;;  %v3252_v23 = vrot.slane %v1014_v39, %v3061_v32 }
 0x113   : > { %v1113_v30 = vcombine.low %v1089_v38, %v1105_v8 }
 0x114   : > { %v3269_v21 = vrot.slane %v1045_v10, %v3236_v59  ;;  %v3300_v46 = vrot.slane %v320_v58, %v3236_v59  ;;  %v344_v9 = vrot.slane %v336_v7, %v3236_v59 }
 0x115   : > { %v3294_v33 = vrot.slane %v1113_v30, %v3236_v59 }
 0x116   : > { %2229 = vrot.lane.b32.xlu1 %v3115_v60, %s2864_s11  ;;  %2215 = vrot.lane.b32.xlu0 %v3131_v5, %s2864_s11  ;;  %v1060_v60 = vrot.slane %v1046_v4, %v3236_v59  ;;  %v1114_v5 = vcombine.high %v1089_v38, %v1105_v8  ;;  %v1077_v22 = vcombine.high %v3269_v21, %v4449_v0 }
 0x117   : > { %4482 = vst [vmem:[#allocation16_spill] sm:$0xff] %v3300_v46  ;;  %v1144_v8 = vrot.slane %v1130_v62, %v3236_v59  ;;  %v1062_v38 = vcombine.high %v3252_v23, %v3246_v25  ;;  %v1769_v62 = vcombine.low %v3152_v14, %v3155_v15 }
 0x118   : > { %v1128_v28 = vrot.slane %v1114_v5, %v3236_v59  ;;  %v1078_v58 = vcombine.high %v1060_v60, %v4449_v0 }
 0x119   : > { %v1076_v50 = vrot.slane %v1062_v38, %v3236_v59  ;;  %v1148_v7 = vcombine.high %v1144_v8, %v4449_v0 }
 0x11a   : > { %2219 = vrot.lane.b32.xlu1 %v3133_v6, %s2864_s11  ;;  %2223 = vrot.lane.b32.xlu0 %v3117_v61, %s2864_s11  ;;  %v335_v61 = vrot.slane %v321_v52, %v3236_v59  ;;  %v1061_v6 = vcombine.low %v3252_v23, %v3246_v25  ;;  %v1137_v52 = vrot.slane %v1129_v55, %v3236_v59 }
 0x11b   : > { %v412_v55 = vrot.slane %v404_v56, %v3236_v59  ;;  %v1145_v56 = vcombine.high %v3294_v33, %v4449_v0  ;;  %v1146_v45 = vcombine.high %v1128_v28, %v4449_v0 }
 0x11c   : > { %v1069_v11 = vrot.slane %v1061_v6, %v3236_v59  ;;  %v353_v40 = vcombine.high %v335_v61, %v4449_v0  ;;  %v1147_v44 = vcombine.high %v1137_v52, %v4449_v0  ;;  %v3375_v6 = vrot.slane %v1769_v62, %v3236_v59 }
 0x11d   : > { %v422_v49 = vcombine.high %v412_v55, %v4449_v0 }
 0x11e   : > { %2227 = vrot.lane.b32.xlu1 %v3123_v63, %s2864_s11  ;;  %1154 = vrot.lane.b32.xlu0 %v1060_v60, %s2866_s12  ;;  %v403_v63 = vrot.slane %v389_v53, %v3236_v59  ;;  %v3283_v53 = vrot.slane %v388_v57, %v3236_v59  ;;  %v352_v57 = vcombine.high %v3300_v46, %v4449_v0 }
 0x11f   : > { %v1079_v48 = vcombine.high %v1069_v11, %v4449_v0  ;;  %4484 = vst [vmem:[#allocation18_spill] sm:$0xff] %v3375_v6 }
 0x120   : > { %4481 = vst [vmem:[#allocation15_spill] sm:$0xff] %v3283_v53  ;;  %v420_v31 = vcombine.high %v3283_v53, %v4449_v0  ;;  %v421_v37 = vcombine.high %v403_v63, %v4449_v0 }
 0x122   : > { %1182 = vrot.lane.b32.xlu1 %v1128_v28, %s2866_s12  ;;  %429 = vrot.lane.b32.xlu0 %v335_v61, %s2866_s12  ;;  %v354_v28 = vcombine.high %v344_v9, %v4449_v0  ;;  %v3372_v61 = vrot.slane %v1837_v17, %v3236_v59  ;;  %v1801_v17 = vcombine.high %v3375_v6, %v4449_v0 }
 0x124   : > { %4483 = vst [vmem:[#allocation17_spill] sm:$0xff] %v3372_v61 }
 0x126   : > { %457 = vrot.lane.b32.xlu1 %v403_v63, %s2866_s12  ;;  %1162 = vrot.lane.b32.xlu0 %v1069_v11, %s2867_s13 }
 0x12a   : > { %1190 = vrot.lane.b32.xlu1 %v1137_v52, %s2867_s13  ;;  %1150 = vrot.lane.b32.xlu0 %v1077_v22, %s2868_s21  ;;  %v1869_v22 = vcombine.high %v3372_v61, %v4449_v0 }
 0x12e   : > { %465 = vrot.lane.b32.xlu1 %v412_v55, %s2867_s13  ;;  %453 = vrot.lane.b32.xlu0 %v420_v31, %s2868_s21 }
 0x130   : > { %v3304_v47 = vpop.permute.xlu0 %521  ;;  %v3312_v34 = vpop.permute.xlu1 %525 }
 0x132   : > { %1178 = vrot.lane.b32.xlu1 %v1145_v56, %s2868_s21  ;;  %425 = vrot.lane.b32.xlu0 %v352_v57, %s2868_s21  ;;  %v419_v57 = vrot.slane %v405_v16, %v3236_v59  ;;  %v1080_v16 = vcombine.high %v1076_v50, %v4449_v0 }
 0x134   : > { %v3314_v42 = vpop.permute.xlu0 %529 }
 0x136   : > { %1186 = vrot.lane.b32.xlu1 %v1146_v45, %s2869_s23  ;;  %1158 = vrot.lane.b32.xlu0 %v1078_v58, %s2869_s23  ;;  %v3399_v45 = vrot.slane %v337_v18, %v3236_v59 }
 0x138   : > { %v3320_v35 = vpop.permute.xlu1 %533  ;;  %v3322_v36 = vpop.permute.xlu0 %519  ;;  %4485 = vst [vmem:[#allocation19_spill] sm:$0xff] %v3399_v45 }
 0x139   : > { %v627_v51 = vcombine.low %v3312_v34, %v3320_v35 }
 0x13a   : > { %461 = vrot.lane.b32.xlu1 %v421_v37, %s2869_s23  ;;  %433 = vrot.lane.b32.xlu0 %v353_v40, %s2869_s23 }
 0x13b   : > { %v3439_v62 = vrot.slane %v627_v51, %v3061_v32 }
 0x13c   : > { %v3328_v41 = vpop.permute.xlu1 %523  ;;  %v3330_v43 = vpop.permute.xlu0 %527 }
 0x13d   : > { %v544_v10 = vcombine.high %v3322_v36, %v3330_v43 }
 0x13e   : > { %1194 = vrot.lane.b32.xlu1 %v1147_v44, %s2870_s24  ;;  %1166 = vrot.lane.b32.xlu0 %v1079_v48, %s2870_s24 }
 0x13f   : > { %v558_v30 = vrot.slane %v544_v10, %v3061_v32 }
 0x140   : > { %v3336_v3 = vpop.permute.xlu1 %531  ;;  %v3338_v4 = vpop.permute.xlu0 %775 }
 0x141   : > { %v560_v5 = vcombine.high %v3328_v41, %v3336_v3 }
 0x142   : > { %1198 = vrot.lane.b32.xlu1 %v1144_v8, %s2871_s26  ;;  %437 = vrot.lane.b32.xlu0 %v344_v9, %s2867_s13  ;;  %v611_v8 = vcombine.low %v3304_v47, %v3314_v42 }
 0x143   : > { %v574_v63 = vrot.slane %v560_v5, %v3061_v32 }
 0x144   : > { %v3352_v39 = vpop.permute.xlu1 %779  ;;  %v3354_v60 = vpop.permute.xlu0 %783  ;;  %v3453_v13 = vrot.slane %v611_v8, %v3061_v32 }
 0x145   : > { %v591_v58 = vcombine.low %v558_v30, %v574_v63  ;;  %v592_v10 = vcombine.high %v558_v30, %v574_v63 }
 0x146   : > { %469 = vrot.lane.b32.xlu1 %v422_v49, %s2870_s24  ;;  %1170 = vrot.lane.b32.xlu0 %v1076_v50, %s2871_s26  ;;  %v3433_v49 = vrot.slane %v1838_v19, %v3236_v59  ;;  %v543_v19 = vcombine.low %v3322_v36, %v3330_v43  ;;  %v423_v36 = vcombine.high %v419_v57, %v4449_v0 }
 0x147   : > { %v3418_v18 = vrot.slane %v591_v58, %v3236_v59 }
 0x148   : > { %v3365_v25 = vpop.permute.xlu1 %787  ;;  %v774_v23 = vpop.permute.xlu0 %773 }
 0x14a   : > { %1202 = vrot.lane.b32.xlu1 %v1148_v7, %s2872_s30  ;;  %441 = vrot.lane.b32.xlu0 %v354_v28, %s2870_s24  ;;  %v559_v7 = vcombine.low %v3328_v41, %v3336_v3  ;;  %v628_v41 = vcombine.high %v3312_v34, %v3320_v35  ;;  %v644_v34 = vcombine.high %v3453_v13, %v3439_v62 }
 0x14c   : > { %v778_v11 = vpop.permute.xlu1 %777  ;;  %v782_v52 = vpop.permute.xlu0 %781  ;;  %v3474_v43 = vrot.slane %v559_v7, %v3061_v32 }
 0x14d   : > { %v797_v55 = vcombine.low %v774_v23, %v782_v52  ;;  %v798_v9 = vcombine.high %v774_v23, %v782_v52 }
 0x14e   : > { %1902 = vrot.lane.b32.xlu1 %v1869_v22, %s2868_s21  ;;  %1874 = vrot.lane.b32.xlu0 %v1801_v17, %s2868_s21  ;;  %v3481_v17 = vrot.slane %v592_v10, %v3236_v59 }
 0x14f   : > { %v3405_v40 = vrot.slane %v797_v55, %v3061_v32  ;;  %v612_v55 = vcombine.high %v3304_v47, %v3314_v42  ;;  %v3505_v47 = vrot.slane %v644_v34, %v3236_v59 }
 0x150   : > { %v786_v31 = vpop.permute.xlu1 %785  ;;  %v3389_v56 = vpop.permute.xlu0 %1493 }
 0x151   : > { %v813_v37 = vcombine.low %v778_v11, %v786_v31  ;;  %v814_v54 = vcombine.high %v778_v11, %v786_v31  ;;  %v3458_v11 = vrot.slane %v798_v9, %v3061_v32  ;;  %v3492_v31 = vrot.slane %v543_v19, %v3061_v32 }
 0x152   : > { %473 = vrot.lane.b32.xlu1 %v419_v57, %s2871_s26  ;;  %445 = vrot.lane.b32.xlu0 %v3399_v45, %s2871_s26  ;;  %v642_v57 = vrot.slane %v628_v41, %v3061_v32  ;;  %v626_v8 = vrot.slane %v612_v55, %v3061_v32  ;;  %v865_v9 = vcombine.low %v3338_v4, %v3354_v60 }
 0x153   : > { %v3408_v44 = vrot.slane %v813_v37, %v3061_v32  ;;  %v3444_v5 = vrot.slane %v814_v54, %v3061_v32  ;;  %v881_v37 = vcombine.low %v3352_v39, %v3365_v25  ;;  %v882_v55 = vcombine.high %v3352_v39, %v3365_v25 }
 0x154   : > { %v3412_v1 = vpop.permute.xlu1 %1497  ;;  %v3414_v2 = vpop.permute.xlu0 %1501  ;;  %v660_v29 = vcombine.high %v626_v8, %v642_v57 }
 0x155   : > { %v830_v48 = vcombine.high %v3405_v40, %v3408_v44  ;;  %v1584_v38 = vcombine.high %v3389_v56, %v3414_v2  ;;  %v845_v35 = vcombine.low %v3458_v11, %v3444_v5  ;;  %v3527_v10 = vrot.slane %v881_v37, %v3061_v32 }
 0x156   : > { %1174 = vrot.lane.b32.xlu1 %v1080_v16, %s2872_s30  ;;  %692 = vrot.lane.b32.xlu0 %v3418_v18, %s2867_s13  ;;  %v576_v16 = vcombine.high %v3492_v31, %v3474_v43  ;;  %v896_v27 = vrot.slane %v882_v55, %v3061_v32  ;;  %v846_v53 = vcombine.high %v3458_v11, %v3444_v5 }
 0x157   : > { %v3436_v50 = vrot.slane %v830_v48, %v3236_v59  ;;  %v3467_v3 = vrot.slane %v1584_v38, %v3061_v32  ;;  %v3508_v42 = vrot.slane %v845_v35, %v3236_v59  ;;  %v3539_v35 = vrot.slane %v865_v9, %v3061_v32 }
 0x158   : > { %v3446_v23 = vpop.permute.xlu1 %1505  ;;  %v3448_v28 = vpop.permute.xlu0 %1963  ;;  %v3534_v41 = vrot.slane %v576_v16, %v3236_v59  ;;  %v866_v9 = vcombine.high %v3338_v4, %v3354_v60  ;;  %v1583_v4 = vcombine.low %v3389_v56, %v3414_v2  ;;  %v3688_v11 = vrot.slane %v846_v53, %v3236_v59 }
 0x159   : > { %v1600_v12 = vcombine.high %v3412_v1, %v3446_v23  ;;  %v1599_v39 = vcombine.low %v3412_v1, %v3446_v23 }
 0x15a   : > { %1906 = vrot.lane.b32.xlu1 %v3433_v49, %s2866_s12  ;;  %938 = vrot.lane.b32.xlu0 %v3436_v50, %s2866_s12  ;;  %v880_v30 = vrot.slane %v866_v9, %v3061_v32  ;;  %v3589_v2 = vrot.slane %v1583_v4, %v3061_v32 }
 0x15b   : > { %v3470_v63 = vrot.slane %v1600_v12, %v3061_v32  ;;  %v3574_v55 = vrot.slane %v1599_v39, %v3061_v32 }
 0x15c   : > { %v3476_v52 = vpop.permute.xlu1 %1967  ;;  %v3478_v22 = vpop.permute.xlu0 %1971  ;;  %v913_v60 = vcombine.low %v880_v30, %v896_v27  ;;  %v914_v0 = vcombine.high %v880_v30, %v896_v27 }
 0x15d   : > { %4486 = vst [vmem:[#allocation20_spill] sm:$0xff] %v3470_v63  ;;  %v2054_v58 = vcombine.high %v3448_v28, %v3478_v22  ;;  %v2053_v9 = vcombine.low %v3448_v28, %v3478_v22 }
 0x15e   : > { %477 = vrot.lane.b32.xlu1 %v423_v36, %s2872_s30  ;;  %700 = vrot.lane.b32.xlu0 %v3481_v17, %s2871_s26  ;;  %v659_v36 = vcombine.low %v626_v8, %v642_v57  ;;  %v3584_v8 = vrot.slane %v660_v29, %v3236_v59  ;;  %v1616_v29 = vcombine.high %v3589_v2, %v3574_v55 }
 0x15f   : > { %v3521_v38 = vrot.slane %v2054_v58, %v3061_v32 }
 0x160   : > { %v1976_v51 = vpop.permute.xlu1 %1975  ;;  %v3502_v54 = vpop.permute.xlu0 %1491  ;;  %v3550_v16 = vrot.slane %v659_v36, %v3236_v59  ;;  %v3637_v45 = vrot.slane %v1616_v29, %v3236_v59  ;;  %v3653_v29 = vrot.slane %v914_v0, %v3236_v59 }
 0x161   : > { %v2070_v48 = vcombine.high %v3476_v52, %v1976_v51  ;;  %v2069_v1 = vcombine.low %v3476_v52, %v1976_v51  ;;  %v3599_v51 = vrot.slane %v913_v60, %v3236_v59 }
 0x162   : > { %712 = vrot.lane.b32.xlu1 %v3505_v47, %s2866_s12  ;;  %946 = vrot.lane.b32.xlu0 %v3508_v42, %s2867_s13 }
 0x163   : > { %v3524_v7 = vrot.slane %v2070_v48, %v3061_v32  ;;  %v898_v48 = vcombine.high %v3539_v35, %v3527_v10  ;;  %v3604_v39 = vrot.slane %v2069_v1, %v3061_v32 }
 0x164   : > { %v3529_v12 = vpop.permute.xlu1 %1495  ;;  %v3531_v19 = vpop.permute.xlu0 %1499 }
 0x165   : > { %v3566_v36 = vrot.slane %v898_v48, %v3236_v59  ;;  %v1515_v60 = vcombine.low %v3502_v54, %v3531_v19 }
 0x166   : > { %684 = vrot.lane.b32.xlu1 %v3534_v41, %s2866_s12 }
 0x167   : > { %v3642_v27 = vrot.slane %v1515_v60, %v3061_v32 }
 0x168   : > { %v3545_v58 = vpop.permute.xlu1 %1503  ;;  %v3547_v37 = vpop.permute.xlu0 %1961 }
 0x169   : > { %4487 = vst [vmem:[#allocation21_spill] sm:$0xff] %v3547_v37  ;;  %v1531_v4 = vcombine.low %v3529_v12, %v3545_v58 }
 0x16a   : > { %720 = vrot.lane.b32.xlu1 %v3550_v16, %s2867_s13 }
 0x16b   : > { %v3627_v6 = vrot.slane %v1531_v4, %v3061_v32  ;;  %v643_v4 = vcombine.low %v3453_v13, %v3439_v62 }
 0x16c   : > { %v3561_v25 = vpop.permute.xlu1 %1965  ;;  %v3563_v34 = vpop.permute.xlu0 %1969 }
 0x16d   : > { %v1985_v23 = vcombine.low %v3547_v37, %v3563_v34  ;;  %v3677_v0 = vrot.slane %v643_v4, %v3236_v59 }
 0x16e   : > { %966 = vrot.lane.b32.xlu1 %v3566_v36, %s2866_s12 }
 0x16f   : > { %v3609_v28 = vrot.slane %v1985_v23, %v3061_v32  ;;  %4488 = vst [vmem:[#allocation22_spill] sm:$0xff] %v3677_v0 }
 0x170   : > { %v3579_v48 = vpop.permute.xlu1 %1973  ;;  %v3581_v57 = vpop.permute.xlu0 %1245 }
 0x171   : > { %v2001_v56 = vcombine.low %v3561_v25, %v3579_v48 }
 0x172   : > { %728 = vrot.lane.b32.xlu1 %v3584_v8, %s2871_s26 }
 0x173   : > { %v3596_v52 = vrot.slane %v2001_v56, %v3061_v32  ;;  %v3616_v56 = vrot.slane %v2053_v9, %v3061_v32 }
 0x174   : > { %v3611_v22 = vpop.permute.xlu1 %1249  ;;  %v3613_v20 = vpop.permute.xlu0 %1253 }
 0x175   : > { %v2018_v1 = vcombine.high %v3609_v28, %v3596_v52  ;;  %v2086_v23 = vcombine.high %v3616_v56, %v3604_v39  ;;  %v1335_v30 = vcombine.low %v3581_v57, %v3613_v20 }
 0x176   : > { %974 = vrot.lane.b32.xlu1 %v3599_v51, %s2867_s13 }
 0x177   : > { %v3634_v61 = vrot.slane %v2018_v1, %v3236_v59  ;;  %v1548_v1 = vcombine.high %v3642_v27, %v3627_v6  ;;  %v3665_v14 = vrot.slane %v2086_v23, %v3236_v59  ;;  %v3670_v62 = vrot.slane %v1335_v30, %v3061_v32 }
 0x178   : > { %v3629_v46 = vpop.permute.xlu1 %1257  ;;  %v3631_v9 = vpop.permute.xlu0 %1243 }
 0x179   : > { %v1351_v26 = vcombine.low %v3611_v22, %v3629_v46  ;;  %2126 = vrot.lane.b32.xlu0 %v3634_v61, %s2866_s12  ;;  %v3691_v30 = vrot.slane %v1548_v1, %v3236_v59 }
 0x17a   : > { %1684 = vrot.lane.b32.xlu1 %v3637_v45, %s2866_s12 }
 0x17b   : > { %v3658_v60 = vrot.slane %v1351_v26, %v3061_v32  ;;  %v575_v26 = vcombine.low %v3492_v31, %v3474_v43  ;;  %v1631_v43 = vcombine.low %v3467_v3, %v3470_v63  ;;  %v897_v63 = vcombine.low %v3539_v35, %v3527_v10 }
 0x17c   : > { %v3660_v24 = vpop.permute.xlu1 %1247  ;;  %v3662_v15 = vpop.permute.xlu0 %1251  ;;  %v829_v10 = vcombine.low %v3405_v40, %v3408_v44  ;;  %v1615_v40 = vcombine.low %v3589_v2, %v3574_v55  ;;  %v2085_v55 = vcombine.low %v3616_v56, %v3604_v39 }
 0x17d   : > { %982 = vrot.lane.b32.xlu0 %v3653_v29, %s2871_s26  ;;  %v1368_v13 = vcombine.high %v3670_v62, %v3658_v60  ;;  %v3709_v1 = vrot.slane %v575_v26, %v3236_v59  ;;  %v3725_v26 = vrot.slane %v1631_v43, %v3236_v59  ;;  %v3742_v43 = vrot.slane %v897_v63, %v3236_v59 }
 0x17e   : > { %2154 = vrot.lane.b32.xlu1 %v3665_v14, %s2866_s12  ;;  %v3758_v63 = vrot.slane %v829_v10, %v3236_v59  ;;  %v3773_v10 = vrot.slane %v1615_v40, %v3236_v59 }
 0x17f   : > { %v3706_v37 = vrot.slane %v1368_v13, %v3236_v59  ;;  %4493 = vst [vmem:[#allocation26_spill] sm:$0xff] %v3709_v1  ;;  %4495 = vst [vmem:[#allocation28_spill] sm:$0xff] %v3742_v43 }
 0x180   : > { %v3683_v23 = vpop.permute.xlu1 %1255  ;;  %v3685_v5 = vpop.permute.xlu0 %2217  ;;  %4497 = vst [vmem:[#allocation30_spill] sm:$0xff] %v3773_v10 }
 0x181   : > { %4489 = vst [vmem:[#allocation23_spill] sm:$0xff] %v3685_v5  ;;  %954 = vrot.lane.b32.xlu0 %v3688_v11, %s2871_s26  ;;  %v4492_v5 = vmov 0.0  }
 0x182   : > { %1656 = vrot.lane.b32.xlu1 %v3691_v30, %s2866_s12  ;;  %v675_v53 = vcombine.high %v3677_v0, %v4492_v5  ;;  %v607_v13 = vcombine.high %v3709_v1, %v4492_v5  ;;  %v676_v35 = vcombine.high %v3505_v47, %v4492_v5  ;;  %v608_v44 = vcombine.high %v3534_v41, %v4492_v5 }
 0x183   : > { %v677_v41 = vcombine.high %v3550_v16, %v4492_v5  ;;  %v930_v39 = vcombine.high %v3566_v36, %v4492_v5  ;;  %v1547_v36 = vcombine.low %v3642_v27, %v3627_v6  ;;  %v678_v6 = vcombine.high %v3584_v8, %v4492_v5 }
 0x184   : > { %v3699_v31 = vpop.permute.xlu1 %2221  ;;  %v3701_v4 = vpop.permute.xlu0 %2225 }
 0x185   : > { %4490 = vst [vmem:[#allocation24_spill] sm:$0xff] %v3699_v31  ;;  %4491 = vst [vmem:[#allocation25_spill] sm:$0xff] %v3701_v4  ;;  %708 = vrot.lane.b32.xlu0 %v675_v53, %s2868_s21  ;;  %v2101_v4 = vcombine.low %v3521_v38, %v3524_v7 }
 0x186   : > { %1436 = vrot.lane.b32.xlu1 %v3706_v37, %s2866_s12 }
 0x187   : > { %v3739_v1 = vrot.slane %v2101_v4, %v3236_v59  ;;  %v929_v4 = vcombine.high %v3742_v43, %v4492_v5  ;;  %v861_v43 = vcombine.high %v3758_v63, %v4492_v5 }
 0x188   : > { %v3718_v31 = vpop.permute.xlu1 %2229  ;;  %v3720_v0 = vpop.permute.xlu0 %2215 }
 0x189   : > { %4494 = vst [vmem:[#allocation27_spill] sm:$0xff] %v3718_v31  ;;  %680 = vrot.lane.b32.xlu0 %v607_v13, %s2868_s21 }
 0x18a   : > { %1692 = vrot.lane.b32.xlu1 %v3725_v26, %s2867_s13 }
 0x18c   : > { %v3734_v53 = vpop.permute.xlu1 %2219  ;;  %v3736_v31 = vpop.permute.xlu0 %2223 }
 0x18d   : > { %716 = vrot.lane.b32.xlu0 %v676_v35, %s2869_s23 }
 0x18e   : > { %2162 = vrot.lane.b32.xlu1 %v3739_v1, %s2867_s13 }
 0x190   : > { %v3751_v47 = vpop.permute.xlu1 %2227  ;;  %v3753_v13 = vpop.permute.xlu0 %1154 }
 0x191   : > { %688 = vrot.lane.b32.xlu0 %v608_v44, %s2869_s23  ;;  %v1647_v44 = vcombine.high %v3773_v10, %v4492_v5 }
 0x192   : > { %962 = vrot.lane.b32.xlu1 %v929_v4, %s2868_s21  ;;  %v3786_v4 = vrot.slane %v2085_v55, %v3236_v59  ;;  %v862_v55 = vcombine.high %v3436_v50, %v4492_v5  ;;  %v1367_v50 = vcombine.low %v3670_v62, %v3658_v60 }
 0x194   : > { %v3766_v2 = vpop.permute.xlu1 %1182  ;;  %v3768_v35 = vpop.permute.xlu0 %429 }
 0x195   : > { %4496 = vst [vmem:[#allocation29_spill] sm:$0xff] %v3768_v35  ;;  %934 = vrot.lane.b32.xlu0 %v861_v43, %s2868_s21  ;;  %v609_v43 = vcombine.high %v3418_v18, %v4492_v5  ;;  %v2117_v35 = vcombine.high %v3786_v4, %v4492_v5  ;;  %v2017_v18 = vcombine.low %v3609_v28, %v3596_v52 }
 0x196   : > { %724 = vrot.lane.b32.xlu1 %v677_v41, %s2870_s24  ;;  %v931_v52 = vcombine.high %v3599_v51, %v4492_v5  ;;  %v3839_v51 = vrot.slane %v1367_v50, %v3236_v59 }
 0x197   : > { %v3826_v28 = vrot.slane %v2017_v18, %v3236_v59  ;;  %v1267_v18 = vcombine.low %v3631_v9, %v3662_v15 }
 0x198   : > { %v3779_v56 = vpop.permute.xlu1 %457  ;;  %v3781_v16 = vpop.permute.xlu0 %1162 }
 0x199   : > { %1680 = vrot.lane.b32.xlu0 %v1647_v44, %s2868_s21  ;;  %v3813_v44 = vrot.slane %v1547_v36, %v3236_v59  ;;  %v1283_v36 = vcombine.low %v3660_v24, %v3683_v23  ;;  %v3857_v50 = vrot.slane %v1267_v18, %v3061_v32 }
 0x19a   : > { %970 = vrot.lane.b32.xlu1 %v930_v39, %s2869_s23 }
 0x19b   : > { %v1579_v8 = vcombine.high %v3813_v44, %v4492_v5 }
 0x19c   : > { %v3794_v40 = vpop.permute.xlu1 %1190  ;;  %v3796_v41 = vpop.permute.xlu0 %1150 }
 0x19d   : > { %696 = vrot.lane.b32.xlu0 %v609_v43, %s2870_s24 }
 0x19e   : > { %2150 = vrot.lane.b32.xlu1 %v2117_v35, %s2868_s21 }
 0x1a0   : > { %v3808_v27 = vpop.permute.xlu1 %465  ;;  %v3810_v39 = vpop.permute.xlu0 %453 }
 0x1a1   : > { %942 = vrot.lane.b32.xlu0 %v862_v55, %s2869_s23  ;;  %v2049_v55 = vcombine.high %v3826_v28, %v4492_v5 }
 0x1a2   : > { %732 = vrot.lane.b32.xlu1 %v678_v6, %s2872_s30  ;;  %v2118_v6 = vcombine.high %v3665_v14, %v4492_v5  ;;  %v1399_v14 = vcombine.high %v3839_v51, %v4492_v5 }
 0x1a4   : > { %v1179_v35 = vpop.permute.xlu1 %1178  ;;  %v3819_v43 = vpop.permute.xlu0 %425 }
 0x1a5   : > { %4498 = vst [vmem:[#allocation31_spill] sm:$0xff] %v3819_v43  ;;  %1652 = vrot.lane.b32.xlu0 %v1579_v8, %s2868_s21  ;;  %v863_v8 = vcombine.high %v3508_v42, %v4492_v5  ;;  %v932_v42 = vcombine.high %v3653_v29, %v4492_v5  ;;  %v1212_v18 = vsel %vm480_vm3, %v3294_v33, %v1179_v35 }
 0x1a6   : > { %978 = vrot.lane.b32.xlu1 %v931_v52, %s2870_s24  ;;  %v3848_v52 = vrot.slane %v1283_v36, %v3061_v32  ;;  %v610_v29 = vcombine.high %v3481_v17, %v4492_v5 }
 0x1a8   : > { %v1187_v60 = vpop.permute.xlu1 %1186  ;;  %v3832_v62 = vpop.permute.xlu0 %1158  ;;  %v1299_v36 = vcombine.low %v3857_v50, %v3848_v52 }
 0x1a9   : > { %2122 = vrot.lane.b32.xlu0 %v2049_v55, %s2868_s21 }
 0x1aa   : > { %2158 = vrot.lane.b32.xlu1 %v2118_v6, %s2869_s23  ;;  %v1648_v6 = vcombine.high %v3637_v45, %v4492_v5  ;;  %v3878_v45 = vrot.slane %v1299_v36, %v3236_v59 }
 0x1ac   : > { %v3850_v43 = vpop.permute.xlu1 %461  ;;  %v3852_v10 = vpop.permute.xlu0 %433 }
 0x1ad   : > { %4499 = vst [vmem:[#allocation32_spill] sm:$0xff] %v3852_v10  ;;  %1432 = vrot.lane.b32.xlu0 %v1399_v14, %s2868_s21  ;;  %v1400_v14 = vcombine.high %v3706_v37, %v4492_v5  ;;  %v1331_v37 = vcombine.high %v3878_v45, %v4492_v5 }
 0x1ae   : > { %950 = vrot.lane.b32.xlu1 %v863_v8, %s2870_s24 }
 0x1b0   : > { %v1195_v55 = vpop.permute.xlu1 %1194  ;;  %v3867_v10 = vpop.permute.xlu0 %1166 }
 0x1b1   : > { %1688 = vrot.lane.b32.xlu0 %v1648_v6, %s2869_s23  ;;  %v1213_v6 = vsel %vm482_vm5, %v1212_v18, %v3766_v2  ;;  %v1532_v18 = vcombine.high %v3529_v12, %v3545_v58  ;;  %v2119_v12 = vcombine.high %v3739_v1, %v4492_v5 }
 0x1b2   : > { %986 = vrot.lane.b32.xlu1 %v932_v42, %s2872_s30  ;;  %v1214_v33 = vsel %vm484_vm4, %v1213_v6, %v1187_v60  ;;  %v1649_v42 = vcombine.high %v3725_v26, %v4492_v5  ;;  %v1870_v60 = vcombine.high %v3433_v49, %v4492_v5  ;;  %v1352_v26 = vcombine.high %v3611_v22, %v3629_v46 }
 0x1b3   : > { %v1215_v2 = vsel %vm486_vm6, %v1214_v33, %v3794_v40  ;;  %v1580_v40 = vcombine.high %v3691_v30, %v4492_v5  ;;  %v1516_v33 = vcombine.high %v3502_v54, %v3531_v19  ;;  %v1336_v49 = vcombine.high %v3581_v57, %v3613_v20 }
 0x1b4   : > { %v1199_v8 = vpop.permute.xlu1 %1198  ;;  %v3885_v17 = vpop.permute.xlu0 %437  ;;  %v1216_v36 = vsel %vm488_vm7, %v1215_v2, %v1195_v55  ;;  %v1205_v46 = vsel %vm480_vm3, %v3269_v21, %v3796_v41  ;;  %v3920_v58 = vrot.slane %v1532_v18, %v3061_v32  ;;  %v3923_v54 = vrot.slane %v1352_v26, %v3061_v32  ;;  %v4500_v2 = vld [vmem:[#allocation21_spill] sm:$0xff] }
 0x1b5   : > { %704 = vrot.lane.b32.xlu0 %v610_v29, %s2872_s30  ;;  %v1217_v29 = vsel %vm490_vm8, %v1216_v36, %v1199_v8  ;;  %v2050_v20 = vcombine.high %v3634_v61, %v4492_v5  ;;  %v1300_v19 = vcombine.high %v3857_v50, %v3848_v52  ;;  %v3932_v21 = vrot.slane %v1516_v33, %v3061_v32 }
 0x1b6   : > { %1440 = vrot.lane.b32.xlu1 %v1400_v14, %s2869_s23  ;;  %v3935_v22 = vrot.slane %v1336_v49, %v3061_v32  ;;  %v1206_v30 = vsel %vm482_vm5, %v1205_v46, %v3753_v13  ;;  %v864_v61 = vcombine.high %v3688_v11, %v4492_v5  ;;  %v2002_v52 = vcombine.high %v3561_v25, %v3579_v48  ;;  %v4501_v25 = vld [vmem:[#allocation15_spill] sm:$0xff] }
 0x1b7   : > { %v1207_v1 = vsel %vm484_vm4, %v1206_v30, %v3832_v62  ;;  %v1563_v41 = vcombine.low %v3932_v21, %v3920_v58  ;;  %v1986_v11 = vcombine.high %v4500_v2, %v3563_v34  ;;  %v494_v48 = vsel %vm480_vm3, %v4501_v25, %v3810_v39 }
 0x1b8   : > { %v3887_v35 = vpop.permute.xlu1 %469  ;;  %v1171_v55 = vpop.permute.xlu0 %1170  ;;  %v1383_v50 = vcombine.low %v3935_v22, %v3923_v54  ;;  %v1208_v62 = vsel %vm486_vm6, %v1207_v1, %v3781_v16  ;;  %v3966_v36 = vrot.slane %v2002_v52, %v3061_v32  ;;  %v495_v39 = vsel %vm482_vm5, %v494_v48, %v3779_v56 }
 0x1b9   : > { %1404 = vrot.lane.b32.xlu0 %v1331_v37, %s2868_s21  ;;  %v1571_v26 = vrot.slane %v1563_v41, %v3236_v59  ;;  %v4511_v25 = vcombine.high %v3521_v38, %v3524_v7  ;;  %v1284_v7 = vcombine.high %v3660_v24, %v3683_v23 }
 0x1ba   : > { %1696 = vrot.lane.b32.xlu1 %v1649_v42, %s2870_s24  ;;  %v1314_v42 = vrot.slane %v1300_v19, %v3236_v59  ;;  %v1391_v16 = vrot.slane %v1383_v50, %v3236_v59  ;;  %v4508_v50 = vld [vmem:[#allocation14_spill] sm:$0xff] }
 0x1bb   : > { %v2116_v48 = vrot.slane %v4511_v25, %v3236_v59  ;;  %v1298_v23 = vrot.slane %v1284_v7, %v3061_v32 }
 0x1bc   : > { %v1203_v14 = vpop.permute.xlu1 %1202  ;;  %v3951_v13 = vpop.permute.xlu0 %441 }
 0x1bd   : > { %v1218_v6 = vsel %vm492_vm9, %v1217_v29, %v1203_v14  ;;  %1660 = vrot.lane.b32.xlu0 %v1580_v40, %s2869_s23  ;;  %v3973_v14 = vrot.slane %v1986_v11, %v3061_v32 }
 0x1be   : > { %v1222_v37 = vrot.slane %v1218_v6, 4  ;;  %1910 = vrot.lane.b32.xlu1 %v1870_v60, %s2869_s23  ;;  %v1209_v60 = vsel %vm488_vm7, %v1208_v62, %v3867_v10  ;;  %v496_v6 = vsel %vm484_vm4, %v495_v39, %v3850_v43  ;;  %v2755_v39 = vld [vmem:[#allocation2 + $0x4a] sm:$0xff] }
 0x1bf   : > { %v1210_v18 = vsel %vm490_vm8, %v1209_v60, %v1171_v55  ;;  %v2033_v33 = vcombine.low %v3973_v14, %v3966_v36  ;;  %v4502_v55 = vld [vmem:[#allocation11_spill] sm:$0xff]  ;;  %v497_v30 = vsel %vm486_vm6, %v496_v6, %v3808_v27 }
 0x1c0   : > { %1226 = vst [vmem:[#allocation3 + $0x18] sm:$0xf0] %v1222_v37  ;;  %v3929_v57 = vpop.permute.xlu1 %1902  ;;  %v3977_v40 = vpop.permute.xlu0 %1874  ;;  %v4503_v37 = vld [vmem:[#allocation12_spill] sm:$0xff]  ;;  %v498_v43 = vsel %vm488_vm7, %v497_v30, %v3887_v35  ;;  %v4510_v35 = vld [vmem:[#allocation19_spill] sm:$0xff] }
 0x1c1   : > { %2130 = vrot.lane.b32.xlu0 %v2050_v20, %s2869_s23  ;;  %v4504_v56 = vcombine.high %v4502_v55, %v4503_v37  ;;  %v2041_v52 = vrot.slane %v2033_v33, %v3236_v59  ;;  %v1581_v55 = vcombine.high %v1571_v26, %v4492_v5  ;;  %v2757_v37 = vld [vmem:[#allocation2 + $0x32] sm:$0xff] }
 0x1c2   : > { %2166 = vrot.lane.b32.xlu1 %v2119_v12, %s2870_s24  ;;  %v4505_v12 = vld [vmem:[#allocation20_spill] sm:$0xff] }
 0x1c3   : > { %v1784_v46 = vrot.slane %v4504_v56, %v3236_v59  ;;  %v4506_v20 = vcombine.high %v3467_v3, %v4505_v12  ;;  %v4507_v3 = vld [vmem:[#allocation13_spill] sm:$0xff]  ;;  %v1268_v12 = vcombine.high %v3631_v9, %v3662_v15 }
 0x1c4   : > { %v474_v8 = vpop.permute.xlu1 %473  ;;  %v4002_v1 = vpop.permute.xlu0 %445  ;;  %v4509_v2 = vcombine.low %v4507_v3, %v4508_v50 }
 0x1c5   : > { %1408 = vrot.lane.b32.xlu0 %v1314_v42, %s2866_s12  ;;  %v1646_v19 = vrot.slane %v4506_v20, %v3236_v59  ;;  %v1282_v15 = vrot.slane %v1268_v12, %v3061_v32 }
 0x1c6   : > { %958 = vrot.lane.b32.xlu1 %v864_v61, %s2872_s30  ;;  %v499_v61 = vsel %vm490_vm8, %v498_v43, %v474_v8  ;;  %v1861_v11 = vrot.slane %v4509_v2, %v3236_v59  ;;  %v355_v8 = vcombine.high %v4510_v35, %v4492_v5  ;;  %v2051_v2 = vcombine.high %v2041_v52, %v4492_v5 }
 0x1c7   : > { %v1564_v35 = vcombine.high %v3932_v21, %v3920_v58  ;;  %v1316_v7 = vcombine.high %v1282_v15, %v1298_v23 }
 0x1c8   : > { %v1175_v34 = vpop.permute.xlu1 %1174  ;;  %v4020_v60 = vpop.permute.xlu0 %692 }
 0x1c9   : > { %v1211_v29 = vsel %vm492_vm9, %v1210_v18, %v1175_v34  ;;  %1664 = vrot.lane.b32.xlu0 %v1571_v26, %s2867_s13  ;;  %v1332_v34 = vcombine.high %v1314_v42, %v4492_v5  ;;  %v1650_v42 = vcombine.high %v1646_v19, %v4492_v5  ;;  %v1802_v26 = vcombine.high %v1784_v46, %v4492_v5 }
 0x1ca   : > { %v1221_v10 = vrot.slane %v1211_v29, 4  ;;  %1444 = vrot.lane.b32.xlu1 %v1391_v16, %s2867_s13  ;;  %v1401_v29 = vcombine.high %v1391_v16, %v4492_v5  ;;  %v2758_v16 = vld [vmem:[#allocation2 + $0x2] sm:$0xff]  ;;  %v1578_v58 = vrot.slane %v1564_v35, %v3236_v59 }
 0x1cb   : > { %v1738_v56 = vcombine.high %v2758_v16, %v2757_v37 }
 0x1cc   : > { %1225 = vst [vmem:[#allocation3 + $0x10] sm:$0xf0] %v1221_v10  ;;  %v3985_v49 = vpop.permute.xlu1 %1906  ;;  %v2756_v10 = vld [vmem:[#allocation2 + $0x1a] sm:$0xff]  ;;  %v4032_v6 = vpop.permute.xlu0 %938  ;;  %v1582_v35 = vcombine.high %v1578_v58, %v4492_v5 }
 0x1cd   : > { %1878 = vrot.lane.b32.xlu0 %v1784_v46, %s2866_s12  ;;  %v1754_v38 = vcombine.high %v2756_v10, %v2755_v39  ;;  %v4051_v30 = vrot.slane %v1738_v56, %v3061_v32  ;;  %v1315_v46 = vcombine.low %v1282_v15, %v1298_v23  ;;  %v4512_v56 = vcombine.high %v4507_v3, %v4508_v50  ;;  %v4513_v3 = vld [vmem:[#allocation27_spill] sm:$0xff]  ;;  %v4514_v50 = vld [vmem:[#allocation24_spill] sm:$0xff] }
 0x1ce   : > { %1700 = vrot.lane.b32.xlu1 %v1646_v19, %s2871_s26  ;;  %v1871_v19 = vcombine.high %v1861_v11, %v4492_v5 }
 0x1cf   : > { %v4043_v24 = vrot.slane %v1754_v38, %v3061_v32  ;;  %v2239_v38 = vcombine.low %v3720_v0, %v3736_v31  ;;  %v1868_v12 = vrot.slane %v4512_v56, %v3236_v59 }
 0x1d0   : > { %v478_v41 = vpop.permute.xlu1 %477  ;;  %v4054_v9 = vpop.permute.xlu0 %700 }
 0x1d1   : > { %v500_v27 = vsel %vm492_vm9, %v499_v61, %v478_v41  ;;  %2134 = vrot.lane.b32.xlu0 %v2041_v52, %s2867_s13  ;;  %v1785_v43 = vcombine.low %v4051_v30, %v4043_v24  ;;  %v1384_v61 = vcombine.high %v3935_v22, %v3923_v54  ;;  %v1323_v52 = vrot.slane %v1315_v46, %v3236_v59 }
 0x1d2   : > { %502 = vst [vmem:[#allocation3 + $0x8] sm:$0xf] %v500_v27  ;;  %1914 = vrot.lane.b32.xlu1 %v1861_v11, %s2867_s13  ;;  %v2120_v11 = vcombine.high %v2116_v48, %v4492_v5  ;;  %v1330_v46 = vrot.slane %v1316_v7, %v3236_v59 }
 0x1d3   : > { %v1793_v27 = vrot.slane %v1785_v43, %v3236_v59  ;;  %v1398_v25 = vrot.slane %v1384_v61, %v3236_v59  ;;  %v1333_v43 = vcombine.high %v1323_v52, %v4492_v5  ;;  %v1872_v61 = vcombine.high %v1868_v12, %v4492_v5 }
 0x1d4   : > { %v4014_v62 = vpop.permute.xlu1 %712  ;;  %v4073_v54 = vpop.permute.xlu0 %946 }
 0x1d5   : > { %449 = vrot.lane.b32.xlu0 %v355_v8, %s2872_s30  ;;  %v2034_v8 = vcombine.high %v3973_v14, %v3966_v36  ;;  %v1803_v21 = vcombine.high %v1793_v27, %v4492_v5  ;;  %v2255_v14 = vcombine.low %v3734_v53, %v3751_v47  ;;  %v1402_v16 = vcombine.high %v1398_v25, %v4492_v5 }
 0x1d6   : > { %2170 = vrot.lane.b32.xlu1 %v2116_v48, %s2871_s26 }
 0x1d7   : > { %v2048_v36 = vrot.slane %v2034_v8, %v3236_v59  ;;  %v1334_v8 = vcombine.high %v1330_v46, %v4492_v5 }
 0x1d8   : > { %v4024_v18 = vpop.permute.xlu1 %684 }
 0x1d9   : > { %1412 = vrot.lane.b32.xlu0 %v1332_v34, %s2869_s23  ;;  %v2052_v10 = vcombine.high %v2048_v36, %v4492_v5 }
 0x1da   : > { %1448 = vrot.lane.b32.xlu1 %v1401_v29, %s2870_s24 }
 0x1dc   : > { %v4034_v33 = vpop.permute.xlu1 %720 }
 0x1dd   : > { %1668 = vrot.lane.b32.xlu0 %v1581_v55, %s2870_s24  ;;  %v2263_v55 = vrot.slane %v2255_v14, %v3061_v32 }
 0x1de   : > { %1704 = vrot.lane.b32.xlu1 %v1650_v42, %s2872_s30 }
 0x1e0   : > { %v4046_v20 = vpop.permute.xlu1 %966 }
 0x1e1   : > { %1882 = vrot.lane.b32.xlu0 %v1802_v26, %s2869_s23  ;;  %v2247_v26 = vrot.slane %v2239_v38, %v3061_v32 }
 0x1e2   : > { %1918 = vrot.lane.b32.xlu1 %v1871_v19, %s2870_s24 }
 0x1e3   : > { %v2271_v23 = vcombine.low %v2247_v26, %v2263_v55  ;;  %v2272_v38 = vcombine.high %v2247_v26, %v2263_v55 }
 0x1e4   : > { %v4062_v41 = vpop.permute.xlu1 %728 }
 0x1e5   : > { %2138 = vrot.lane.b32.xlu0 %v2051_v2, %s2870_s24  ;;  %v2323_v2 = vcombine.low %v4514_v50, %v4513_v3  ;;  %v2286_v26 = vrot.slane %v2272_v38, %v3236_v59 }
 0x1e6   : > { %2174 = vrot.lane.b32.xlu1 %v2120_v11, %s2872_s30 }
 0x1e7   : > { %v4135_v14 = vrot.slane %v2323_v2, %v3061_v32 }
 0x1e8   : > { %v4075_v22 = vpop.permute.xlu1 %974 }
 0x1e9   : > { %1416 = vrot.lane.b32.xlu0 %v1323_v52, %s2867_s13  ;;  %v4128_v52 = vrot.slane %v2271_v23, %v3236_v59  ;;  %v2240_v23 = vcombine.high %v3720_v0, %v3736_v31 }
 0x1ea   : > { %1452 = vrot.lane.b32.xlu1 %v1398_v25, %s2871_s26  ;;  %v4515_v25 = vld [vmem:[#allocation25_spill] sm:$0xff] }
 0x1eb   : > { %v4081_v48 = vpop.permute.xlu0 %2126  ;;  %v2254_v2 = vrot.slane %v2240_v23, %v3061_v32 }
 0x1ec   : > { %v4083_v34 = vpop.permute.xlu1 %1684 }
 0x1ed   : > { %1672 = vrot.lane.b32.xlu0 %v1578_v58, %s2871_s26 }
 0x1ee   : > { %1890 = vrot.lane.b32.xlu1 %v1803_v21, %s2870_s24  ;;  %v4516_v21 = vld [vmem:[#allocation23_spill] sm:$0xff] }
 0x1ef   : > { %v4092_v29 = vpop.permute.xlu0 %982 }
 0x1f0   : > { %v4094_v39 = vpop.permute.xlu1 %2154 }
 0x1f1   : > { %1886 = vrot.lane.b32.xlu0 %v1793_v27, %s2867_s13 }
 0x1f2   : > { %2146 = vrot.lane.b32.xlu1 %v2052_v10, %s2872_s30  ;;  %v2256_v10 = vcombine.high %v3734_v53, %v3751_v47 }
 0x1f3   : > { %v4102_v42 = vpop.permute.xlu0 %954 }
 0x1f4   : > { %v4104_v37 = vpop.permute.xlu1 %1656  ;;  %v2270_v53 = vrot.slane %v2256_v10, %v3061_v32  ;;  %v4517_v10 = vld [vmem:[#allocation22_spill] sm:$0xff] }
 0x1f5   : > { %2142 = vrot.lane.b32.xlu0 %v2048_v36, %s2871_s26  ;;  %v2307_v36 = vcombine.low %v4516_v21, %v4515_v25 }
 0x1f6   : > { %1456 = vrot.lane.b32.xlu1 %v1402_v16, %s2872_s30  ;;  %v2303_v16 = vcombine.high %v4128_v52, %v4492_v5  ;;  %v2287_v0 = vcombine.low %v2254_v2, %v2270_v53 }
 0x1f7   : > { %v709_v19 = vpop.permute.xlu0 %708  ;;  %v2315_v56 = vrot.slane %v2307_v36, %v3061_v32 }
 0x1f8   : > { %v4114_v15 = vpop.permute.xlu1 %1436  ;;  %v742_v38 = vsel %vm480_vm3, %v4517_v10, %v709_v19  ;;  %v2295_v19 = vrot.slane %v2287_v0, %v3236_v59  ;;  %v2288_v10 = vcombine.high %v2254_v2, %v2270_v53 }
 0x1f9   : > { %1420 = vrot.lane.b32.xlu0 %v1333_v43, %s2870_s24  ;;  %v2339_v43 = vcombine.low %v2315_v56, %v4135_v14 }
 0x1fa   : > { %1926 = vrot.lane.b32.xlu1 %v1872_v61, %s2872_s30  ;;  %v1786_v61 = vcombine.high %v4051_v30, %v4043_v24  ;;  %v4518_v24 = vld [vmem:[#allocation26_spill] sm:$0xff] }
 0x1fb   : > { %v681_v11 = vpop.permute.xlu0 %680  ;;  %v4161_v36 = vrot.slane %v2339_v43, %v3236_v59 }
 0x1fc   : > { %v4123_v27 = vpop.permute.xlu1 %1692  ;;  %v735_v30 = vsel %vm480_vm3, %v4518_v24, %v681_v11  ;;  %v2305_v24 = vcombine.high %v2295_v19, %v4492_v5 }
 0x1fd   : > { %1676 = vrot.lane.b32.xlu0 %v1582_v35, %s2872_s30  ;;  %v1800_v35 = vrot.slane %v1786_v61, %v3236_v59 }
 0x1fe   : > { %1428 = vrot.lane.b32.xlu1 %v1334_v8, %s2872_s30  ;;  %v2304_v8 = vcombine.high %v2286_v26, %v4492_v5 }
 0x1ff   : > { %v717_v58 = vpop.permute.xlu0 %716 }
 0x200   : > { %v4139_v7 = vpop.permute.xlu1 %2162 }
 0x201   : > { %1922 = vrot.lane.b32.xlu0 %v1868_v12, %s2871_s26 }
 0x202   : > { %2376 = vrot.lane.b32.xlu1 %v2303_v16, %s2868_s21  ;;  %v736_v16 = vsel %vm482_vm5, %v735_v30, %v4024_v18  ;;  %v2340_v18 = vcombine.high %v2315_v56, %v4135_v14 }
 0x203   : > { %v689_v47 = vpop.permute.xlu0 %688 }
 0x204   : > { %v4150_v55 = vpop.permute.xlu1 %962  ;;  %v737_v61 = vsel %vm484_vm4, %v736_v16, %v689_v47 }
 0x205   : > { %1424 = vrot.lane.b32.xlu0 %v1330_v46, %s2871_s26  ;;  %v743_v46 = vsel %vm482_vm5, %v742_v38, %v4014_v62  ;;  %v2324_v62 = vcombine.high %v4514_v50, %v4513_v3 }
 0x206   : > { %2380 = vrot.lane.b32.xlu1 %v2286_v26, %s2866_s12  ;;  %v2371_v26 = vcombine.high %v4161_v36, %v4492_v5  ;;  %v744_v11 = vsel %vm484_vm4, %v743_v46, %v717_v58  ;;  %v738_v58 = vsel %vm486_vm6, %v737_v61, %v4020_v60 }
 0x207   : > { %v935_v31 = vpop.permute.xlu0 %934  ;;  %v745_v38 = vsel %vm486_vm6, %v744_v11, %v4034_v33  ;;  %v2308_v33 = vcombine.high %v4516_v21, %v4515_v25  ;;  %v2338_v56 = vrot.slane %v2324_v62, %v3061_v32  ;;  %v2354_v21 = vrot.slane %v2340_v18, %v3236_v59  ;;  %v4519_v11 = vld [vmem:[#allocation28_spill] sm:$0xff] }
 0x208   : > { %v725_v12 = vpop.permute.xlu1 %724  ;;  %v989_v30 = vsel %vm480_vm3, %v3758_v63, %v935_v31  ;;  %v2302_v31 = vrot.slane %v2288_v10, %v3236_v59 }
 0x209   : > { %1894 = vrot.lane.b32.xlu0 %v1800_v35, %s2871_s26  ;;  %v746_v3 = vsel %vm488_vm7, %v745_v38, %v725_v12  ;;  %v990_v53 = vsel %vm482_vm5, %v989_v30, %v4032_v6 }
 0x20a   : > { %2384 = vrot.lane.b32.xlu1 %v2304_v8, %s2869_s23  ;;  %v1804_v8 = vcombine.high %v1800_v35, %v4492_v5  ;;  %v747_v25 = vsel %vm490_vm8, %v746_v3, %v4062_v41 }
 0x20b   : > { %v4173_v23 = vpop.permute.xlu0 %1680 }
 0x20c   : > { %v971_v43 = vpop.permute.xlu1 %970 }
 0x20d   : > { %2404 = vrot.lane.b32.xlu0 %v2371_v26, %s2868_s21  ;;  %v2372_v26 = vcombine.high %v2354_v21, %v4492_v5  ;;  %s2789_s21 = scalar_lea.vmem %s4401_s9, 256 }
 0x20e   : > { %2388 = vrot.lane.b32.xlu1 %v2295_v19, %s2867_s13  ;;  %v2306_v19 = vcombine.high %v2302_v31, %v4492_v5  ;;  %p2790_p6 = scmp.ne.s32.totalorder %s4401_s9, %s2789_s21 }
 0x20f   : > { %v697_v0 = vpop.permute.xlu0 %696 }
 0x210   : > { %v2151_v47 = vpop.permute.xlu1 %2150  ;;  %v739_v50 = vsel %vm488_vm7, %v738_v58, %v697_v0  ;;  %p2791_p12 = pnand %p2790_p6, %p4527_p11 }
 0x211   : > { %v2184_v14 = vsel %vm480_vm3, %v3786_v4, %v2151_v47  ;;  %1898 = vrot.lane.b32.xlu0 %v1804_v8, %s2872_s30  ;;  %v740_v63 = vsel %vm490_vm8, %v739_v50, %v4054_v9  ;;  %v2322_v9 = vrot.slane %v2308_v33, %v3061_v32  ;;  %v996_v32 = vsel %vm480_vm3, %v4519_v11, %v4150_v55 }
 0x212   : > { %2392 = vrot.lane.b32.xlu1 %v2305_v24, %s2870_s24  ;;  %v2185_v60 = vsel %vm482_vm5, %v2184_v14, %v4094_v39  ;;  %v997_v62 = vsel %vm482_vm5, %v996_v32, %v4046_v20  ;;  %v4520_v24 = vld [vmem:[#allocation30_spill] sm:$0xff]  ;;  %p2792_p13 = pneg %p2791_p12 }
 0x213   : > { %v943_v2 = vpop.permute.xlu0 %942  ;;  %v2355_v46 = vcombine.low %v2322_v9, %v2338_v56  ;;  %v998_v55 = vsel %vm484_vm4, %v997_v62, %v971_v43  ;;  %v2356_v58 = vcombine.high %v2322_v9, %v2338_v56  ;;  %v1714_v30 = vsel %vm480_vm3, %v4520_v24, %v4173_v23  ;;  %v4522_v62 = vld [vmem:[#allocation31_spill] sm:$0xff] }
 0x214   : > { %v733_v4 = vpop.permute.xlu1 %732  ;;  %v991_v12 = vsel %vm484_vm4, %v990_v53, %v943_v2  ;;  %v999_v0 = vsel %vm486_vm6, %v998_v55, %v4075_v22  ;;  %v1715_v14 = vsel %vm482_vm5, %v1714_v30, %v4083_v34 }
 0x215   : > { %v748_v39 = vsel %vm492_vm9, %v747_v25, %v733_v4  ;;  %2408 = vrot.lane.b32.xlu0 %v2354_v21, %s2866_s12  ;;  %v992_v6 = vsel %vm486_vm6, %v991_v12, %v4073_v54  ;;  %v2363_v10 = vrot.slane %v2355_v46, %v3236_v59  ;;  %v2458_v25 = vld [vmem:[%s4445_s2] sm:$0xff] }
 0x216   : > { %v752_v35 = vrot.slane %v748_v39, 4  ;;  %2396 = vrot.lane.b32.xlu1 %v2302_v31, %s2871_s26 }
 0x217   : > { %v1653_v41 = vpop.permute.xlu0 %1652 }
 0x218   : > { %756 = vst [vmem:[#allocation3 + $0x8] sm:$0xf0] %v752_v35  ;;  %v979_v16 = vpop.permute.xlu1 %978  ;;  %v1707_v61 = vsel %vm480_vm3, %v3813_v44, %v1653_v41 }
 0x219   : > { %2412 = vrot.lane.b32.xlu0 %v2372_v26, %s2869_s23  ;;  %v4230_v54 = vsel %vm482_vm5, %v1707_v61, %v4104_v37  ;;  %v1000_v3 = vsel %vm488_vm7, %v999_v0, %v979_v16  ;;  %s2874_s23 = smov [#allocation8]  }
 0x21a   : > { %2400 = vrot.lane.b32.xlu1 %v2306_v19, %s2872_s30 }
 0x21b   : > { %v2123_v18 = vpop.permute.xlu0 %2122 }
 0x21c   : > { %v2159_v8 = vpop.permute.xlu1 %2158  ;;  %v2177_v44 = vsel %vm480_vm3, %v3826_v28, %v2123_v18  ;;  %v2373_v28 = vcombine.high %v2363_v10, %v4492_v5  ;;  %v4523_v18 = vld [vmem:[#allocation16_spill] sm:$0xff] }
 0x21d   : > { %v2186_v38 = vsel %vm484_vm4, %v2185_v60, %v2159_v8  ;;  %2416 = vrot.lane.b32.xlu0 %v2363_v10, %s2867_s13  ;;  %v4242_v37 = vsel %vm482_vm5, %v2177_v44, %v4081_v48  ;;  %v1001_v60 = vsel %vm490_vm8, %v1000_v3, %v4092_v29  ;;  %v2873_v29 = vmov 0   ;;  %v4524_v10 = vld [vmem:[#allocation29_spill] sm:$0xff]  ;;  %s4399_s13 = scalar_lea.hbm %s4447_s4, %s2659_s16 }
 0x21e   : > { %v4246_v20 = vsel %vm486_vm6, %v2186_v38, %v4139_v7  ;;  %2730 = vset.pattern.permute.xlu0 %v2873_v29  ;;  %v481_v8 = vsel %vm480_vm3, %v4523_v18, %v4522_v62 }
 0x21f   : > { %v1433_v43 = vpop.permute.xlu0 %1432  ;;  %v2449_v31 = vld [vmem:[#allocation3 + $0x8] sm:$0xff]  ;;  %v483_v55 = vsel %vm482_vm5, %v481_v8, %v4524_v10 }
 0x220   : > { %v951_v47 = vpop.permute.xlu1 %950  ;;  %v1466_v48 = vsel %vm480_vm3, %v3839_v51, %v1433_v43  ;;  %v2370_v51 = vrot.slane %v2356_v58, %v3236_v59  ;;  %v4525_v58 = vld [vmem:[#allocation32_spill] sm:$0xff] }
 0x221   : > { %v993_v7 = vsel %vm488_vm7, %v992_v6, %v951_v47  ;;  %2420 = vrot.lane.b32.xlu0 %v2373_v28, %s2870_s24  ;;  %v4261_v22 = vsel %vm482_vm5, %v1466_v48, %v4114_v15  ;;  %v485_v0 = vsel %vm484_vm4, %v483_v55, %v4525_v58  ;;  %s2793_s24 = sshll.u32 %s2874_s23, 4  ;;  %s2794_s24 = int_to_ptr.vmem [resolvable:$false] %s2793_s24 }
 0x222   : > { %v994_v50 = vsel %vm490_vm8, %v993_v7, %v4102_v42  ;;  %v2374_v34 = vcombine.high %v2370_v51, %v4492_v5  ;;  %v4521_v5 = vld [vmem:[#allocation17_spill] sm:$0xff]  ;;  %v487_v43 = vsel %vm486_vm6, %v485_v0, %v3885_v17  ;;  %p2796_p8 = scmp.lt.s32.totalorder %s4401_s9, %s2794_s24 }
 0x223   : > { %v1689_v23 = vpop.permute.xlu0 %1688  ;;  %v489_v47 = vsel %vm488_vm7, %v487_v43, %v3951_v13 }
 0x224   : > { %v987_v33 = vpop.permute.xlu1 %986  ;;  %v1716_v56 = vsel %vm484_vm4, %v1715_v14, %v1689_v23  ;;  %v491_v28 = vsel %vm490_vm8, %v489_v47, %v4002_v1 }
 0x225   : > { %v1002_v53 = vsel %vm492_vm9, %v1001_v60, %v987_v33  ;;  %2424 = vrot.lane.b32.xlu0 %v2370_v51, %s2871_s26  ;;  %v1717_v42 = vsel %vm486_vm6, %v1716_v56, %v4123_v27  ;;  %s2795_s26 = scalar_lea.vmem %s2794_s24, 512 }
 0x226   : > { %1004 = vst [vmem:[#allocation3 + $0x18] sm:$0xf] %v1002_v53  ;;  %p2797_p10 = scmp.lt.s32.totalorder %s2795_s26, %s2789_s21 }
 0x227   : > { %v705_v15 = vpop.permute.xlu0 %704 }
 0x228   : > { %v4275_v2 = vpop.permute.xlu1 %1440  ;;  %v741_v4 = vsel %vm492_vm9, %v740_v63, %v705_v15  ;;  %v1936_v63 = vsel %vm480_vm3, %v4521_v5, %v3929_v57  ;;  %p2798_p0 = por %p2797_p10, %p2796_p8 }
 0x229   : > { %v751_v59 = vrot.slane %v741_v4, 4  ;;  %2428 = vrot.lane.b32.xlu0 %v2374_v34, %s2872_s30  ;;  %v1937_v9 = vsel %vm482_vm5, %v1936_v63, %v3985_v49  ;;  %v1468_v63 = vsel %vm484_vm4, %v4261_v22, %v4275_v2 }
 0x22a   : > { %p2799_p2 = pnand %p2798_p0, %p2792_p13 }
 0x22b   : > { %755 = vst [vmem:[#allocation3] sm:$0xf0] %v751_v59  ;;  %v4283_v21 = vpop.permute.xlu0 %1404 }
 0x22c   : > { %v1697_v27 = vpop.permute.xlu1 %1696 }
 0x22d   : > { %v2451_v12 = vld [vmem:[#allocation3 + $0x18] sm:$0xff]  ;;  %2461 = vperm.xlu0 %2730, %v2458_v25  }
 0x22e   : > { %v2660_v39 = vpack.c.bf16 %v2451_v12, %v2449_v31 }
 0x22f   : > { %v4290_v35 = vpop.permute.xlu0 %1660 }
 0x230   : > { %v1911_v6 = vpop.permute.xlu1 %1910  ;;  %2661 = vmatprep.subr.bf16.mxu0 %v2660_v39 }
 0x231   : > { %v4293_v46 = vsel %vm484_vm4, %v1937_v9, %v1911_v6 }
 0x233   : > { %v2131_v41 = vpop.permute.xlu0 %2130 }
 0x234   : > { %v2167_v16 = vpop.permute.xlu1 %2166 }
 0x235   : > { %v2188_v15 = vsel %vm488_vm7, %v4246_v20, %v2167_v16  ;;  %v2179_v20 = vsel %vm484_vm4, %v4242_v37, %v2131_v41 }
 0x237   : > { %v4295_v26 = vpop.permute.xlu0 %1408 }
 0x238   : > { %v959_v19 = vpop.permute.xlu1 %958 }
 0x239   : > { %v995_v11 = vsel %vm492_vm9, %v994_v50, %v959_v19  ;;  %v1718_v50 = vsel %vm488_vm7, %v1717_v42, %v1697_v27 }
 0x23a   : > { %1003 = vst [vmem:[#allocation3 + $0x10] sm:$0xf] %v995_v11 }
 0x23b   : > { %v4298_v32 = vpop.permute.xlu0 %1664 }
 0x23c   : > { %v1445_v57 = vpop.permute.xlu1 %1444 }
 0x23d   : > { %v1469_v9 = vsel %vm486_vm6, %v1468_v63, %v1445_v57  ;;  %v1709_v57 = vsel %vm484_vm4, %v4230_v54, %v4290_v35  ;;  %v1459_v54 = vsel %vm480_vm3, %v3878_v45, %v4283_v21 }
 0x23e   : > { %v1710_v10 = vsel %vm486_vm6, %v1709_v57, %v4298_v32 }
 0x23f   : > { %v4300_v61 = vpop.permute.xlu0 %1878 }
 0x240   : > { %v1701_v49 = vpop.permute.xlu1 %1700 }
 0x241   : > { %v1719_v14 = vsel %vm490_vm8, %v1718_v50, %v1701_v49  ;;  %v2450_v13 = vld [vmem:[#allocation3 + $0x10] sm:$0xff] }
 0x243   : > { %v2135_v44 = vpop.permute.xlu0 %2134 }
 0x244   : > { %v4307_v38 = vpop.permute.xlu1 %1914  ;;  %v2180_v6 = vsel %vm486_vm6, %v2179_v20, %v2135_v44 }
 0x247   : > { %v450_v24 = vpop.permute.xlu0 %449 }
 0x248   : > { %v2171_v30 = vpop.permute.xlu1 %2170  ;;  %v493_v3 = vsel %vm492_vm9, %v491_v28, %v450_v24  ;;  %v1939_v28 = vsel %vm486_vm6, %v4293_v46, %v4307_v38 }
 0x249   : > { %501 = vst [vmem:[#allocation3] sm:$0xf] %v493_v3  ;;  %v2189_v42 = vsel %vm490_vm8, %v2188_v15, %v2171_v30  ;;  %v1460_v30 = vsel %vm482_vm5, %v1459_v54, %v4295_v26 }
 0x24b   : > { %v1413_v48 = vpop.permute.xlu0 %1412 }
 0x24c   : > { %v1449_v7 = vpop.permute.xlu1 %1448 }
 0x24d   : > { %v1470_v16 = vsel %vm488_vm7, %v1469_v9, %v1449_v7  ;;  %v1461_v7 = vsel %vm484_vm4, %v1460_v30, %v1413_v48 }
 0x24f   : > { %v1669_v23 = vpop.permute.xlu0 %1668 }
 0x250   : > { %v1705_v33 = vpop.permute.xlu1 %1704  ;;  %v2448_v60 = vld [vmem:[#allocation3] sm:$0xff]  ;;  %v1711_v55 = vsel %vm488_vm7, %v1710_v10, %v1669_v23 }
 0x251   : > { %v1720_v17 = vsel %vm492_vm9, %v1719_v14, %v1705_v33  ;;  %v2662_v56 = vpack.c.bf16 %v2450_v13, %v2448_v60 }
 0x252   : > { %v1724_v51 = vrot.slane %v1720_v17, 4  ;;  %v4526_v17 = vld [vmem:[#allocation18_spill] sm:$0xff] }
 0x253   : > { %2663 = vmatpush1.bf16.msra.mxu0 %v2662_v56  ;;  %v4321_v1 = vpop.permute.xlu0 %1882  ;;  %v1929_v48 = vsel %vm480_vm3, %v4526_v17, %v3977_v40 }
 0x254   : > { %1728 = vst [vmem:[#allocation3 + $0x28] sm:$0xf0] %v1724_v51  ;;  %v1919_v53 = vpop.permute.xlu1 %1918  ;;  %v1930_v60 = vsel %vm482_vm5, %v1929_v48, %v4300_v61 }
 0x255   : > { %v1940_v35 = vsel %vm488_vm7, %v1939_v28, %v1919_v53  ;;  %v1931_v56 = vsel %vm484_vm4, %v1930_v60, %v4321_v1 }
 0x257   : > { %v2139_v34 = vpop.permute.xlu0 %2138 }
 0x258   : > { %v2175_v4 = vpop.permute.xlu1 %2174  ;;  %v2181_v19 = vsel %vm488_vm7, %v2180_v6, %v2139_v34 }
 0x259   : > { %v2190_v29 = vsel %vm492_vm9, %v2189_v42, %v2175_v4 }
 0x25a   : > { %v2194_v59 = vrot.slane %v2190_v29, 4 }
 0x25b   : > { %v1417_v25 = vpop.permute.xlu0 %1416 }
 0x25c   : > { %2198 = vst [vmem:[#allocation3 + $0x38] sm:$0xf0] %v2194_v59  ;;  %v1453_v27 = vpop.permute.xlu1 %1452  ;;  %v1462_v46 = vsel %vm486_vm6, %v1461_v7, %v1417_v25 }
 0x25d   : > { %v1471_v11 = vsel %vm490_vm8, %v1470_v16, %v1453_v27 }
 0x25f   : > { %v1673_v31 = vpop.permute.xlu0 %1672 }
 0x260   : > { %v1891_v12 = vpop.permute.xlu1 %1890  ;;  %v1712_v44 = vsel %vm490_vm8, %v1711_v55, %v1673_v31 }
 0x263   : > { %v1887_v39 = vpop.permute.xlu0 %1886 }
 0x264   : > { %v2147_v5 = vpop.permute.xlu1 %2146  ;;  %v1932_v15 = vsel %vm486_vm6, %v1931_v56, %v1887_v39 }
 0x265   : > { %v1933_v4 = vsel %vm488_vm7, %v1932_v15, %v1891_v12 }
 0x267   : > { %v2143_v49 = vpop.permute.xlu0 %2142 }
 0x268   : > { %v1457_v62 = vpop.permute.xlu1 %1456  ;;  %v2182_v18 = vsel %vm490_vm8, %v2181_v19, %v2143_v49 }
 0x269   : > { %v1472_v8 = vsel %vm492_vm9, %v1471_v11, %v1457_v62  ;;  %v2183_v22 = vsel %vm492_vm9, %v2182_v18, %v2147_v5 }
 0x26a   : > { %1474 = vst [vmem:[#allocation3 + $0x28] sm:$0xf] %v1472_v8  ;;  %v2193_v37 = vrot.slane %v2183_v22, 4 }
 0x26b   : > { %v1421_v2 = vpop.permute.xlu0 %1420 }
 0x26c   : > { %v1927_v41 = vpop.permute.xlu1 %1926  ;;  %2197 = vst [vmem:[#allocation3 + $0x30] sm:$0xf0] %v2193_v37  ;;  %v1463_v38 = vsel %vm488_vm7, %v1462_v46, %v1421_v2 }
 0x26f   : > { %v1677_v58 = vpop.permute.xlu0 %1676 }
 0x270   : > { %v1429_v0 = vpop.permute.xlu1 %1428  ;;  %v1713_v43 = vsel %vm492_vm9, %v1712_v44, %v1677_v58 }
 0x271   : > { %v1723_v47 = vrot.slane %v1713_v43, 4  ;;  %v2453_v13 = vld [vmem:[#allocation3 + $0x28] sm:$0xff]  ;;  %v2549_v43 = vstv %s2548_s14 }
 0x273   : > { %1727 = vst [vmem:[#allocation3 + $0x20] sm:$0xf0] %v1723_v47  ;;  %v1923_v32 = vpop.permute.xlu0 %1922 }
 0x274   : > { %v2377_v24 = vpop.permute.xlu1 %2376  ;;  %v1941_v3 = vsel %vm490_vm8, %v1940_v35, %v1923_v32 }
 0x275   : > { %v1942_v50 = vsel %vm492_vm9, %v1941_v3, %v1927_v41  ;;  %v2431_v61 = vsel %vm480_vm3, %v4128_v52, %v2377_v24 }
 0x276   : > { %1944 = vst [vmem:[#allocation3 + $0x38] sm:$0xf] %v1942_v50 }
 0x277   : > { %v1425_v45 = vpop.permute.xlu0 %1424 }
 0x278   : > { %v2381_v21 = vpop.permute.xlu1 %2380  ;;  %v1464_v14 = vsel %vm490_vm8, %v1463_v38, %v1425_v45 }
 0x279   : > { %v1465_v23 = vsel %vm492_vm9, %v1464_v14, %v1429_v0  ;;  %v2432_v1 = vsel %vm482_vm5, %v2431_v61, %v2381_v21 }
 0x27a   : > { %1473 = vst [vmem:[#allocation3 + $0x20] sm:$0xf] %v1465_v23 }
 0x27b   : > { %v1895_v33 = vpop.permute.xlu0 %1894 }
 0x27c   : > { %v2385_v26 = vpop.permute.xlu1 %2384  ;;  %v1934_v29 = vsel %vm490_vm8, %v1933_v4, %v1895_v33 }
 0x27d   : > { %v2455_v51 = vld [vmem:[#allocation3 + $0x38] sm:$0xff]  ;;  %v2433_v39 = vsel %vm484_vm4, %v2432_v1, %v2385_v26 }
 0x27e   : > { %v2664_v53 = vpack.c.bf16 %v2455_v51, %v2453_v13 }
 0x27f   : > { %v2405_v42 = vpop.permute.xlu0 %2404 }
 0x280   : > { %v2389_v34 = vpop.permute.xlu1 %2388  ;;  %2665 = vmatprep.subr.bf16.mxu0 %v2664_v53  ;;  %v2438_v62 = vsel %vm480_vm3, %v4161_v36, %v2405_v42  ;;  %v2447_v36 = vld [vmem:[%s4444_s1] sm:$0xff] }
 0x281   : > { %v2434_v5 = vsel %vm486_vm6, %v2433_v39, %v2389_v34  ;;  %v2452_v16 = vld [vmem:[#allocation3 + $0x20] sm:$0xff] }
 0x283   : > { %v1899_v59 = vpop.permute.xlu0 %1898 }
 0x284   : > { %v2393_v40 = vpop.permute.xlu1 %2392  ;;  %v1935_v25 = vsel %vm492_vm9, %v1934_v29, %v1899_v59 }
 0x285   : > { %1943 = vst [vmem:[#allocation3 + $0x30] sm:$0xf] %v1935_v25  ;;  %v2435_v12 = vsel %vm488_vm7, %v2434_v5, %v2393_v40 }
 0x287   : > { %v2409_v27 = vpop.permute.xlu0 %2408 }
 0x288   : > { %v2397_v31 = vpop.permute.xlu1 %2396  ;;  %v2439_v18 = vsel %vm482_vm5, %v2438_v62, %v2409_v27 }
 0x289   : > { %v2436_v63 = vsel %vm490_vm8, %v2435_v12, %v2397_v31 }
 0x28b   : > { %v2413_v20 = vpop.permute.xlu0 %2412 }
 0x28c   : > { %v2401_v9 = vpop.permute.xlu1 %2400  ;;  %v2454_v19 = vld [vmem:[#allocation3 + $0x30] sm:$0xff]  ;;  %v2440_v22 = vsel %vm484_vm4, %v2439_v18, %v2413_v20 }
 0x28d   : > { %v2437_v6 = vsel %vm492_vm9, %v2436_v63, %v2401_v9  ;;  %v2666_v52 = vpack.c.bf16 %v2454_v19, %v2452_v16 }
 0x28e   : > { %2445 = vst [vmem:[#allocation3 + $0x40] sm:$0xf] %v2437_v6 }
 0x28f   : > { %2667 = vmatpush1.bf16.msra.mxu0 %v2666_v52  ;;  %v2417_v11 = vpop.permute.xlu0 %2416 }
 0x290   : > { %v2441_v37 = vsel %vm486_vm6, %v2440_v22, %v2417_v11 }
 0x293   : > { %v2421_v49 = vpop.permute.xlu0 %2420 }
 0x294   : > { %v2442_v2 = vsel %vm488_vm7, %v2441_v37, %v2421_v49 }
 0x295   : > { %v2456_v44 = vld [vmem:[#allocation3 + $0x40] sm:$0xf] }
 0x297   : > { %v2425_v8 = vpop.permute.xlu0 %2424 }
 0x298   : > { %v2443_v41 = vsel %vm490_vm8, %v2442_v2, %v2425_v8 }
 0x29b   : > { %v2429_v57 = vpop.permute.xlu0 %2428 }
 0x29c   : > { %v2444_v10 = vsel %vm492_vm9, %v2443_v41, %v2429_v57 }
 0x29d   : > { %2446 = vst [vmem:[#allocation3 + $0x48] sm:$0xf] %v2444_v10 }
 0x2a4   : > { %v2457_v55 = vld [vmem:[#allocation3 + $0x48] sm:$0xf] }
 0x2a5   : > { %2650 = vmatprep.subr.msk.mxu0 %vm2468_vm10, %v2457_v55 }
 0x2a6   : > { %2651 = vmatpush1.msk.msra.mxu0 %vm2468_vm10, %v2456_v44 }
 0x2a7   : > { %2652 = vmatmul.mubr.msk.f32.vlgmr.msra.gmra.mrb[0].mxu0 %vm2464_vm11, %v2447_v36 }
 0x2ac   : > { %v2462_v58 = vpop.permute.xlu0 %2461 }
 0x37a   : > { %v2541_v0 = vpop.f32.mrb[0].mxu0 }
 0x37b   : > { %v2542_v47 = vadd.f32 %v2541_v0, %v2462_v58  ;;  %v2543_v28 = vpop.f32.mrb[1].mxu0 }
 0x37c   : > { %v2544_v54 = vadd.f32 %v2543_v28, %v2462_v58 }
 0x37d   : > { %vm2546_vm12 = vcmp.gt.f32.partialorder %v2542_v47, 0.0  ;;  %v2550_v35 = vmul.f32 %v2549_v43, %v2542_v47 }
 0x37e   : > { %vm2547_vm13 = vcmp.gt.f32.partialorder %v2544_v54, 0.0  ;;  %v2551_v32 = vmul.f32 %v2549_v43, %v2544_v54 }
 0x37f   : > { %v2552_v24 = vsel %vm2546_vm12, %v2542_v47, %v2550_v35 }
 0x380   : > { %2554 = vst [vmem:[%s216_s27] sm:$0xff] %v2552_v24  ;;  %v2553_v30 = vsel %vm2547_vm13, %v2544_v54, %v2551_v32 }
 0x381   : > { %2555 = vst [vmem:[%s216_s27 + $0x8] sm:$0xff] %v2553_v30 }
 0x382   : > { %2802 = shalt.err (!%p2799_p2)
}
 0x383   : > { %s2803_s10 = scalar_lea.hbm %s4399_s13, 256  ;;  %s2807_s6 = scalar_lea.hbm %s4447_s4, 512 }
 0x384   : > { %p2804_p4 = scmp.ne.s32.totalorder %s4399_s13, %s2803_s10  ;;  %p2808_p9 = scmp.lt.u32.totalorder %s4399_s13, %s4447_s4 }
 0x385   : > { %p2809_p1 = scmp.lt.u32.totalorder %s2807_s6, %s2803_s10  ;;  %p2811_p6 = scmp.lt.u32.totalorder %s2803_s10, %s4399_s13 }
 0x386   : > { %p2805_p5 = pnand %p2804_p4, %p4527_p11 }
 0x387   : > { %p2810_p3 = por %p2809_p1, %p2808_p9 }
 0x388   : > { %p2806_p7 = pneg %p2805_p5 }
 0x389   : > { %p2812_p12 = por %p2811_p6, %p2810_p3 }
 0x38b   : > { %p2813_p13 = pnand %p2812_p12, %p2806_p7 }
 0x38d   : > { %2816 = shalt.err (!%p2813_p13)
}
 0x38e   : > { %2670 = dma.vmem_to_hbm [thread:$0]  (%p4527_p11), %s4401_s9, 256, %s4399_s13, %s2557_s3  }
 0x38f PF: > { %s2583_s14 = sand.u32 1, %s2843_s17   ;;  %p4528_p8 = scmp.ne.s32.totalorder %s4475_s29, 0 }
 0x390   : > { %p4529_p10 = scmp.ge.s32.totalorder %s2855_s20, 2  ;;  %s2584_s15 = scalar_lea.sflag [#allocation7], %s2583_s14 }
 0x392   : > { %p2677_p0 = pnand %p4529_p10, %p4528_p8 }
 0x394   : > { %2838 = dma.done.wait (!%p2677_p0), %s2584_s15, 256  }
 0x395   : > { %2840 = vsyncadd (!%p2677_p0), %s2584_s15, 4294967040  ;;  %p18_p2 = scmp.ge.s32.totalorder %s2928_s22, 4   ;;  %s4530_s17 = smov %s2847_s18 }
 0x396   : > { %s4531_s18 = smov %s2851_s19  ;;  %s4532_s19 = smov %s2940_s25 }
 0x397   : > { %s4533_s20 = smov %s2928_s22  ;;  %20 = sbr.rel (!%p18_p2) target bundleno = 7 (0x7), region = 81 }
 0x39e   :  { %2589 = vsyncpa [#allocation6], 1 }
 0x39f   :  { %2591 = vsyncpa [#allocation6 + $0x1], 1 }
 0x3a0   :  { %2592 = vsyncpa [#allocation7], 1 }
 0x3a1   :  { %2594 = vsyncpa [#allocation7 + $0x1], 1 }

</bundles_post_ra>
